<compile_context>
chip_gen: v6e
topology: v6e:2x2x1
jax: 0.10.0
libtpu: 0.0.40
codegen_flags: <defaults>
</compile_context>

<pallas_src>
import math

import numpy as np

import jax
import jax.numpy as jnp
from jax.experimental import pallas as pl
from jax.experimental.pallas import tpu as pltpu

INPUT_DIM = 102
FEAT_PAD = 128          # lane-dense feature padding (102 -> 128)
HIDDEN_RATIO = 0.75


def _round_up(v, m):
    return ((v + m - 1) // m) * m


def make_clusters():
    # TODO(synk): real clusters come from Kitsune's feature mapper; use a deterministic
    # max-10-feature disjoint partition of the 102 features as a stand-in.
    return [list(range(i, min(i + 10, INPUT_DIM))) for i in range(0, INPUT_DIM, 10)]


def init_params(key, clusters):
    """Deterministic params mimicking nn.Linear default init, stored as (in, out).

    TODO(synk): norm_min/norm_max values stand in for ../artifacts/.../norm_params.pkl.
    """
    n = len(clusters)
    head_hidden = int(math.ceil(n * HIDDEN_RATIO))
    keys = iter(jax.random.split(key, 6 * n + 6))

    def linear(k_w, k_b, fan_in, fan_out):
        bound = 1.0 / math.sqrt(fan_in)
        w = jax.random.uniform(k_w, (fan_in, fan_out), jnp.float32, -bound, bound)
        b = jax.random.uniform(k_b, (fan_out,), jnp.float32, -bound, bound)
        return w, b

    p = {"tail_enc_w": [], "tail_enc_b": [], "tail_dec_w": [], "tail_dec_b": [],
         "norm_min": [], "norm_max": []}
    for c in clusters:
        fin = len(c)
        hid = int(math.ceil(fin * HIDDEN_RATIO))
        ew, eb = linear(next(keys), next(keys), fin, hid)
        dw, db = linear(next(keys), next(keys), hid, fin)
        nmin = -jax.random.uniform(next(keys), (fin,), jnp.float32, 0.0, 0.5)
        nmax = 1.0 + jax.random.uniform(next(keys), (fin,), jnp.float32, 0.0, 0.5)
        p["tail_enc_w"].append(ew)
        p["tail_enc_b"].append(eb)
        p["tail_dec_w"].append(dw)
        p["tail_dec_b"].append(db)
        p["norm_min"].append(nmin)
        p["norm_max"].append(nmax)

    p["head_enc_w"], p["head_enc_b"] = linear(next(keys), next(keys), n, head_hidden)
    p["head_dec_w"], p["head_dec_b"] = linear(next(keys), next(keys), head_hidden, n)
    p["norm_min_out"] = jax.random.uniform(next(keys), (n,), jnp.float32, 0.0, 0.05)
    p["norm_max_out"] = jax.random.uniform(next(keys), (n,), jnp.float32, 0.5, 1.0)
    return p


def pack_params(params, clusters):
    """Pack the whole ragged ensemble into two dense lane-full matrices + masks."""
    n = len(clusters)
    n_pad = _round_up(n, 8)
    h1_pad = max(int(math.ceil(len(c) * HIDDEN_RATIO)) for c in clusters)
    h_all = _round_up(n_pad * h1_pad, 128)      # fused hidden width (128 for 11 clusters)
    hh = params["head_enc_w"].shape[1]
    hh_pad = _round_up(hh, 8)

    # The block-combined decoder + single fused error/SSE pass rely on the clusters
    # being a DISJOINT partition of the features (true for Kitsune's feature mapper).
    # TODO(synk): re-verify against the real feature-mapper clusters.
    flat = [i for c in clusters for i in c]
    assert len(flat) == len(set(flat)), "clusters must be disjoint for the fused kernel"

    w1 = np.zeros((FEAT_PAD, h_all), np.float32)    # fused encoders (128 -> H_ALL)
    b1 = np.zeros((1, h_all), np.float32)
    w2 = np.zeros((h_all, FEAT_PAD), np.float32)    # fused decoders (H_ALL -> 128)
    b2 = np.zeros((1, FEAT_PAD), np.float32)
    fmask = np.zeros((1, FEAT_PAD), np.float32)     # valid (covered) feature columns
    seg_t = np.zeros((n_pad, FEAT_PAD), np.float32)  # one-hot feature -> cluster map
    nmin_x = np.zeros((1, FEAT_PAD), np.float32)     # per-feature norm params
    nmax_x = np.ones((1, FEAT_PAD), np.float32)
    sizes = np.ones((n_pad,), np.float32)

    for k, idx in enumerate(clusters):
        idx = np.asarray(idx, np.int64)
        ew = np.asarray(params["tail_enc_w"][k], np.float32)   # (len_c, hid)
        eb = np.asarray(params["tail_enc_b"][k], np.float32)
        dw = np.asarray(params["tail_dec_w"][k], np.float32)   # (hid, len_c)
        db = np.asarray(params["tail_dec_b"][k], np.float32)
        hid = ew.shape[1]
        col0 = k * h1_pad
        cols = col0 + np.arange(hid)
        w1[idx[:, None], cols[None, :]] = ew
        b1[0, col0:col0 + hid] = eb
        w2[cols[:, None], idx[None, :]] = dw
        b2[0, idx] = db
        fmask[0, idx] = 1.0
        seg_t[k, idx] = 1.0
        nmin_x[0, idx] = np.asarray(params["norm_min"][k], np.float32)
        nmax_x[0, idx] = np.asarray(params["norm_max"][k], np.float32)
        sizes[k] = float(len(idx))

    nmin_o = np.zeros((n_pad, 1), np.float32)
    nmax_o = np.ones((n_pad, 1), np.float32)
    nmin_o[:n, 0] = np.asarray(params["norm_min_out"], np.float32)
    nmax_o[:n, 0] = np.asarray(params["norm_max_out"], np.float32)

    wh1 = np.zeros((n_pad, hh_pad), np.float32)
    bh1 = np.zeros((1, hh_pad), np.float32)
    wh2t = np.zeros((n_pad, hh_pad), np.float32)
    bh2 = np.zeros((n_pad, 1), np.float32)
    wh1[:n, :hh] = np.asarray(params["head_enc_w"], np.float32)
    bh1[0, :hh] = np.asarray(params["head_enc_b"], np.float32)
    wh2t[:n, :hh] = np.asarray(params["head_dec_w"], np.float32).T
    bh2[:n, 0] = np.asarray(params["head_dec_b"], np.float32)

    return dict(
        n_clusters=n, n_pad=n_pad, h_all=h_all, hh_pad=hh_pad,
        cluster_sizes=sizes,
        w1=jnp.asarray(w1), b1=jnp.asarray(b1),
        w2=jnp.asarray(w2), b2=jnp.asarray(b2),
        fmask=jnp.asarray(fmask), seg_t=jnp.asarray(seg_t),
        nmin_x=jnp.asarray(nmin_x), nmax_x=jnp.asarray(nmax_x),
        nmin_o=jnp.asarray(nmin_o), nmax_o=jnp.asarray(nmax_o),
        wh1=jnp.asarray(wh1), bh1=jnp.asarray(bh1),
        wh2t=jnp.asarray(wh2t), bh2=jnp.asarray(bh2),
    )


def _const_spec(shape):
    """Grid-invariant, single-buffered (never re-fetched) parameter block."""
    zeros = (0,) * len(shape)
    return pl.BlockSpec(shape, lambda i, _z=zeros: _z, pipeline_mode=pl.Buffered(1))


def kitnet_forward(x, packed, *, block_b=512):
    """Fused KitNET forward. Returns (head_out, tails), each shaped (n_clusters,)."""
    assert block_b % 8 == 0, "batch tile must be sublane-aligned"
    x = jnp.asarray(x, jnp.float32).reshape(-1, INPUT_DIM)
    batch = x.shape[0]
    num_tiles = int(pl.cdiv(batch, block_b))
    batch_pad = num_tiles * block_b

    n = packed["n_clusters"]
    n_pad = packed["n_pad"]
    h_all = packed["h_all"]
    hh_pad = packed["hh_pad"]

    # Lane-dense, zero-padded activation slab: (batch_pad, 128).
    x_pad = jnp.zeros((batch_pad, FEAT_PAD), jnp.float32).at[:batch, :INPUT_DIM].set(x)

    # 1 / (B * len_c): RMSE denominators (padded clusters get a harmless 1/B).
    # NOTE: distinct batch sizes retrace anyway (x_pad's shape changes), so baking
    # float(batch) here costs nothing extra.
    inv_denom = jnp.asarray(
        (1.0 / (float(batch) * packed["cluster_sizes"]))
        .astype(np.float32).reshape(n_pad, 1))

    def kernel(x_ref, nminx_ref, nmaxx_ref, w1_ref, b1_ref, w2_ref, b2_ref,
               fmask_ref, seg_ref, invd_ref, nmino_ref, nmaxo_ref,
               wh1_ref, bh1_ref, wh2t_ref, bh2_ref,
               head_ref, tails_ref, acc_ref):
        step = pl.program_id(0)

        @pl.when(step == 0)
        def _init():
            acc_ref[...] = jnp.zeros_like(acc_ref)

        # Normalize the whole 128-wide tile in one shot (padded cols: (0-0)/(1+eps)=0).
        xn = (x_ref[...] - nminx_ref[...]) / (nmaxx_ref[...] - nminx_ref[...] + 1e-16)

        # Row mask for the zero-padded tail of the batch.
        row = jax.lax.broadcasted_iota(jnp.int32, (block_b, 1), 0) + step * block_b
        rmask = (row < batch).astype(jnp.float32)

        # Whole tail ensemble = two dense lane-full MXU matmuls + ONE sigmoid/error
        # pass.  Cluster c's encoder only reads its own feature rows of W1_all and its
        # decoder only writes its own (disjoint) feature columns of W2_all, so the
        # combined reconstruction is exactly the per-cluster reconstruction per column.
        h = jax.nn.sigmoid(
            jnp.dot(xn, w1_ref[...], preferred_element_type=jnp.float32) + b1_ref[...])
        out = jax.nn.sigmoid(
            jnp.dot(h, w2_ref[...], preferred_element_type=jnp.float32) + b2_ref[...])
        d = out - xn
        sq = d * d * fmask_ref[...] * rmask          # mask padded cols + padded rows
        # Single column-SSE reduce + ONE accumulator store per batch tile.
        acc_ref[...] = acc_ref[...] + jnp.sum(sq, axis=0, keepdims=True)

        # Final grid step: regroup columns -> per-cluster SSE, RMSE, clamp, normalise,
        # and run the tiny head autoencoder.
        @pl.when(step == pl.num_programs(0) - 1)
        def _finalize():
            # seg_t is the one-hot feature->cluster map; broadcast-multiply + lane
            # reduce gives per-cluster SSE without any transpose.
            sse = jnp.sum(seg_ref[...] * acc_ref[...], axis=1, keepdims=True)  # (n_pad,1)
            rmse = jnp.sqrt(sse * invd_ref[...])
            tails = jnp.where(rmse == 0.0, 0.01, rmse)                  # loss.data clamp
            tails_n = (tails - nmino_ref[...]) / (
                nmaxo_ref[...] - nmino_ref[...] + 1e-16)
            # Head encoder/decoder as broadcast+reduce (the vector is tiny).
            hh = jax.nn.sigmoid(
                jnp.sum(tails_n * wh1_ref[...], axis=0, keepdims=True) + bh1_ref[...])
            ho = jax.nn.sigmoid(
                jnp.sum(wh2t_ref[...] * hh, axis=1, keepdims=True) + bh2_ref[...])
            head_ref[...] = ho
            tails_ref[...] = tails_n

    grid_spec = pltpu.PrefetchScalarGridSpec(
        num_scalar_prefetch=0,
        grid=(num_tiles,),
        in_specs=[
            pl.BlockSpec((block_b, FEAT_PAD), lambda i: (i, 0)),   # x tile (pipelined)
            _const_spec((1, FEAT_PAD)),                            # norm min (x)
            _const_spec((1, FEAT_PAD)),                            # norm max (x)
            _const_spec((FEAT_PAD, h_all)),                        # fused encoder W
            _const_spec((1, h_all)),                               # fused encoder b
            _const_spec((h_all, FEAT_PAD)),                        # fused decoder W
            _const_spec((1, FEAT_PAD)),                            # fused decoder b
            _const_spec((1, FEAT_PAD)),                            # feature column mask
            _const_spec((n_pad, FEAT_PAD)),                        # feature->cluster map
            _const_spec((n_pad, 1)),                               # 1/(B*len_c)
            _const_spec((n_pad, 1)),                               # norm min (out)
            _const_spec((n_pad, 1)),                               # norm max (out)
            _const_spec((n_pad, hh_pad)),                          # head enc W
            _const_spec((1, hh_pad)),                              # head enc b
            _const_spec((n_pad, hh_pad)),                          # head dec W^T
            _const_spec((n_pad, 1)),                               # head dec b
        ],
        out_specs=[
            pl.BlockSpec((n_pad, 1), lambda i: (0, 0)),            # head output
            pl.BlockSpec((n_pad, 1), lambda i: (0, 0)),            # tails (normed)
        ],
        scratch_shapes=[pltpu.VMEM((1, FEAT_PAD), jnp.float32)],   # column-SSE accum
    )

    head_pad, tails_pad = pl.pallas_call(
        kernel,
        out_shape=(jax.ShapeDtypeStruct((n_pad, 1), jnp.float32),
                   jax.ShapeDtypeStruct((n_pad, 1), jnp.float32)),
        grid_spec=grid_spec,
        compiler_params=pltpu.CompilerParams(
            # batch is a reduction axis (losses aggregate over the whole batch)
            dimension_semantics=("arbitrary",),
        ),
    )(x_pad, packed["nmin_x"], packed["nmax_x"],
      packed["w1"], packed["b1"], packed["w2"], packed["b2"],
      packed["fmask"], packed["seg_t"],
      inv_denom, packed["nmin_o"], packed["nmax_o"],
      packed["wh1"], packed["bh1"], packed["wh2t"], packed["bh2"])

    return head_pad[:n, 0], tails_pad[:n, 0]


def kitnet_reference(x, params, clusters):
    """Pure-JAX reference mirroring the PyTorch KitNET.forward."""
    x = jnp.asarray(x, jnp.float32).reshape(-1, INPUT_DIM)
    losses = []
    for k, idx in enumerate(clusters):
        xc = x[:, jnp.asarray(idx)]
        xc = (xc - params["norm_min"][k]) / (
            params["norm_max"][k] - params["norm_min"][k] + 1e-16)
        h = jax.nn.sigmoid(xc @ params["tail_enc_w"][k] + params["tail_enc_b"][k])
        out = jax.nn.sigmoid(h @ params["tail_dec_w"][k] + params["tail_dec_b"][k])
        loss = jnp.sqrt(jnp.mean((out - xc) ** 2))
        losses.append(jnp.where(loss == 0.0, 0.01, loss))
    tails = jnp.stack(losses)
    tails = (tails - params["norm_min_out"]) / (
        params["norm_max_out"] - params["norm_min_out"] + 1e-16)
    hh = jax.nn.sigmoid(tails @ params["head_enc_w"] + params["head_enc_b"])
    ho = jax.nn.sigmoid(hh @ params["head_dec_w"] + params["head_dec_b"])
    return ho, tails


if __name__ == "__main__":
    key = jax.random.PRNGKey(0)
    k_params, k_x = jax.random.split(key)

    clusters = make_clusters()
    params = init_params(k_params, clusters)
    packed = pack_params(params, clusters)

    batch = 500  # NOT a multiple of the tile: exercises row masking AND accumulation
    x = jax.random.uniform(k_x, (batch, INPUT_DIM), dtype=jnp.float32)

    head_out, tails = kitnet_forward(x, packed, block_b=256)
    head_out, tails = jax.block_until_ready((head_out, tails))

    ref_head, ref_tails = kitnet_reference(x, params, clusters)
    n = len(clusters)
    assert head_out.shape == (n,) and tails.shape == (n,)
    assert jnp.allclose(tails, ref_tails, atol=5e-5, rtol=5e-5), "tails mismatch"
    assert jnp.allclose(head_out, ref_head, atol=5e-5, rtol=5e-5), "head output mismatch"

    print("KERNEL_OK")
</pallas_src>

<mosaic_0001>
module attributes {stable_mosaic.version = 11 : i64} {
  func.func @kernel(%arg0: i32, %arg1: memref<256x128xf32, #tpu.memory_space<vmem>>, %arg2: memref<1x128xf32, #tpu.memory_space<vmem>>, %arg3: memref<1x128xf32, #tpu.memory_space<vmem>>, %arg4: memref<128x128xf32, #tpu.memory_space<vmem>>, %arg5: memref<1x128xf32, #tpu.memory_space<vmem>>, %arg6: memref<128x128xf32, #tpu.memory_space<vmem>>, %arg7: memref<1x128xf32, #tpu.memory_space<vmem>>, %arg8: memref<1x128xf32, #tpu.memory_space<vmem>>, %arg9: memref<16x128xf32, #tpu.memory_space<vmem>>, %arg10: memref<16x1xf32, #tpu.memory_space<vmem>>, %arg11: memref<16x1xf32, #tpu.memory_space<vmem>>, %arg12: memref<16x1xf32, #tpu.memory_space<vmem>>, %arg13: memref<16x16xf32, #tpu.memory_space<vmem>>, %arg14: memref<1x16xf32, #tpu.memory_space<vmem>>, %arg15: memref<16x16xf32, #tpu.memory_space<vmem>>, %arg16: memref<16x1xf32, #tpu.memory_space<vmem>>, %arg17: memref<16x1xf32, #tpu.memory_space<vmem>>, %arg18: memref<16x1xf32, #tpu.memory_space<vmem>>, %arg19: memref<1x128xf32, #tpu.memory_space<vmem>>) attributes {dimension_semantics = [#tpu.dimension_semantics<arbitrary>], iteration_bounds = array<i64: 2>, scalar_prefetch = 0 : i64, scratch_operands = 1 : i64, tpu.core_type = #tpu.core_type<tc>, window_params = [{transform_indices = @transform_0, window_bounds = array<i64: 256, 128>}, {pipeline_mode = #tpu.pipeline_mode<synchronous>, transform_indices = @transform_1, window_bounds = array<i64: 1, 128>}, {pipeline_mode = #tpu.pipeline_mode<synchronous>, transform_indices = @transform_2, window_bounds = array<i64: 1, 128>}, {pipeline_mode = #tpu.pipeline_mode<synchronous>, transform_indices = @transform_3, window_bounds = array<i64: 128, 128>}, {pipeline_mode = #tpu.pipeline_mode<synchronous>, transform_indices = @transform_4, window_bounds = array<i64: 1, 128>}, {pipeline_mode = #tpu.pipeline_mode<synchronous>, transform_indices = @transform_5, window_bounds = array<i64: 128, 128>}, {pipeline_mode = #tpu.pipeline_mode<synchronous>, transform_indices = @transform_6, window_bounds = array<i64: 1, 128>}, {pipeline_mode = #tpu.pipeline_mode<synchronous>, transform_indices = @transform_7, window_bounds = array<i64: 1, 128>}, {pipeline_mode = #tpu.pipeline_mode<synchronous>, transform_indices = @transform_8, window_bounds = array<i64: 16, 128>}, {pipeline_mode = #tpu.pipeline_mode<synchronous>, transform_indices = @transform_9, window_bounds = array<i64: 16, 1>}, {pipeline_mode = #tpu.pipeline_mode<synchronous>, transform_indices = @transform_10, window_bounds = array<i64: 16, 1>}, {pipeline_mode = #tpu.pipeline_mode<synchronous>, transform_indices = @transform_11, window_bounds = array<i64: 16, 1>}, {pipeline_mode = #tpu.pipeline_mode<synchronous>, transform_indices = @transform_12, window_bounds = array<i64: 16, 16>}, {pipeline_mode = #tpu.pipeline_mode<synchronous>, transform_indices = @transform_13, window_bounds = array<i64: 1, 16>}, {pipeline_mode = #tpu.pipeline_mode<synchronous>, transform_indices = @transform_14, window_bounds = array<i64: 16, 16>}, {pipeline_mode = #tpu.pipeline_mode<synchronous>, transform_indices = @transform_15, window_bounds = array<i64: 16, 1>}, {pipeline_mode = #tpu.pipeline_mode<synchronous>, transform_indices = @transform_16, window_bounds = array<i64: 16, 1>}, {pipeline_mode = #tpu.pipeline_mode<synchronous>, transform_indices = @transform_17, window_bounds = array<i64: 16, 1>}]} {
    %c0_i32 = arith.constant 0 : i32
    %0 = arith.cmpi eq, %arg0, %c0_i32 : i32
    %1 = arith.extui %0 : i1 to i32
    %c0_i32_0 = arith.constant 0 : i32
    %2 = arith.cmpi ne, %1, %c0_i32_0 : i32
    scf.if %2 {
      %cst_28 = arith.constant 0.000000e+00 : f32
      %57 = vector.broadcast %cst_28 : f32 to vector<1x128xf32>
      %c0_29 = arith.constant 0 : index
      %c0_30 = arith.constant 0 : index
      %58 = vector.load %arg19[%c0_29, %c0_30] : memref<1x128xf32, #tpu.memory_space<vmem>>, vector<1x128xf32>
      tpu.vector_store %arg19[%c0_29, %c0_30], %57 {strides = array<i32>} : memref<1x128xf32, #tpu.memory_space<vmem>>, vector<1x128xf32>,
    } else {
    }
    %c0 = arith.constant 0 : index
    %c0_1 = arith.constant 0 : index
    %3 = vector.load %arg1[%c0, %c0_1] : memref<256x128xf32, #tpu.memory_space<vmem>>, vector<256x128xf32>
    %c0_2 = arith.constant 0 : index
    %c0_3 = arith.constant 0 : index
    %4 = vector.load %arg2[%c0_2, %c0_3] : memref<1x128xf32, #tpu.memory_space<vmem>>, vector<1x128xf32>
    %5 = vector.broadcast %4 : vector<1x128xf32> to vector<256x128xf32>
    %6 = arith.subf %3, %5 : vector<256x128xf32>
    %c0_4 = arith.constant 0 : index
    %c0_5 = arith.constant 0 : index
    %7 = vector.load %arg3[%c0_4, %c0_5] : memref<1x128xf32, #tpu.memory_space<vmem>>, vector<1x128xf32>
    %c0_6 = arith.constant 0 : index
    %c0_7 = arith.constant 0 : index
    %8 = vector.load %arg2[%c0_6, %c0_7] : memref<1x128xf32, #tpu.memory_space<vmem>>, vector<1x128xf32>
    %9 = arith.subf %7, %8 : vector<1x128xf32>
    %cst = arith.constant 1.000000e-16 : f32
    %10 = vector.broadcast %cst : f32 to vector<1x128xf32>
    %11 = arith.addf %9, %10 : vector<1x128xf32>
    %12 = vector.broadcast %11 : vector<1x128xf32> to vector<256x128xf32>
    %13 = arith.divf %6, %12 : vector<256x128xf32>
    %14 = tpu.iota {dimensions = array<i32: 0>} : vector<256x1xi32>
    %c256_i32 = arith.constant 256 : i32
    %15 = arith.muli %arg0, %c256_i32 : i32
    %16 = vector.broadcast %15 : i32 to vector<256x1xi32>
    %17 = arith.addi %14, %16 : vector<256x1xi32>
    %c500_i32 = arith.constant 500 : i32
    %18 = vector.broadcast %c500_i32 : i32 to vector<256x1xi32>
    %19 = arith.cmpi slt, %17, %18 : vector<256x1xi32>
    %20 = arith.extui %19 : vector<256x1xi1> to vector<256x1xi32>
    %21 = arith.sitofp %20 : vector<256x1xi32> to vector<256x1xf32>
    %c0_8 = arith.constant 0 : index
    %c0_9 = arith.constant 0 : index
    %22 = vector.load %arg4[%c0_8, %c0_9] : memref<128x128xf32, #tpu.memory_space<vmem>>, vector<128x128xf32>
    %cst_10 = arith.constant dense<0.000000e+00> : vector<256x128xf32>
    %23 = tpu.matmul %13, %22, %cst_10 {dimension_numbers = #tpu.dot_dimension_numbers<[1], [0], [0], [1], [0, 0, 1, 1], [], []>} : vector<256x128xf32>, vector<128x128xf32>, vector<256x128xf32> -> vector<256x128xf32>
    %c0_11 = arith.constant 0 : index
    %c0_12 = arith.constant 0 : index
    %24 = vector.load %arg5[%c0_11, %c0_12] : memref<1x128xf32, #tpu.memory_space<vmem>>, vector<1x128xf32>
    %25 = vector.broadcast %24 : vector<1x128xf32> to vector<256x128xf32>
    %26 = arith.addf %23, %25 : vector<256x128xf32>
    %27 = arith.negf %26 : vector<256x128xf32>
    %28 = math.exp %27 : vector<256x128xf32>
    %cst_13 = arith.constant 1.000000e+00 : f32
    %29 = vector.broadcast %cst_13 : f32 to vector<256x128xf32>
    %30 = arith.addf %29, %28 : vector<256x128xf32>
    %31 = arith.divf %29, %30 : vector<256x128xf32>
    %c0_14 = arith.constant 0 : index
    %c0_15 = arith.constant 0 : index
    %32 = vector.load %arg6[%c0_14, %c0_15] : memref<128x128xf32, #tpu.memory_space<vmem>>, vector<128x128xf32>
    %cst_16 = arith.constant dense<0.000000e+00> : vector<256x128xf32>
    %33 = tpu.matmul %31, %32, %cst_16 {dimension_numbers = #tpu.dot_dimension_numbers<[1], [0], [0], [1], [0, 0, 1, 1], [], []>} : vector<256x128xf32>, vector<128x128xf32>, vector<256x128xf32> -> vector<256x128xf32>
    %c0_17 = arith.constant 0 : index
    %c0_18 = arith.constant 0 : index
    %34 = vector.load %arg7[%c0_17, %c0_18] : memref<1x128xf32, #tpu.memory_space<vmem>>, vector<1x128xf32>
    %35 = vector.broadcast %34 : vector<1x128xf32> to vector<256x128xf32>
    %36 = arith.addf %33, %35 : vector<256x128xf32>
    %37 = arith.negf %36 : vector<256x128xf32>
    %38 = math.exp %37 : vector<256x128xf32>
    %cst_19 = arith.constant 1.000000e+00 : f32
    %39 = vector.broadcast %cst_19 : f32 to vector<256x128xf32>
    %40 = arith.addf %39, %38 : vector<256x128xf32>
    %41 = arith.divf %39, %40 : vector<256x128xf32>
    %42 = arith.subf %41, %13 : vector<256x128xf32>
    %43 = arith.mulf %42, %42 : vector<256x128xf32>
    %c0_20 = arith.constant 0 : index
    %c0_21 = arith.constant 0 : index
    %44 = vector.load %arg8[%c0_20, %c0_21] : memref<1x128xf32, #tpu.memory_space<vmem>>, vector<1x128xf32>
    %45 = vector.broadcast %44 : vector<1x128xf32> to vector<256x128xf32>
    %46 = arith.mulf %43, %45 : vector<256x128xf32>
    %47 = vector.broadcast %21 : vector<256x1xf32> to vector<256x128xf32>
    %48 = arith.mulf %46, %47 : vector<256x128xf32>
    %c0_22 = arith.constant 0 : index
    %c0_23 = arith.constant 0 : index
    %49 = vector.load %arg19[%c0_22, %c0_23] : memref<1x128xf32, #tpu.memory_space<vmem>>, vector<1x128xf32>
    %cst_24 = arith.constant dense<0.000000e+00> : vector<128xf32>
    %50 = vector.multi_reduction <add>, %48, %cst_24 [0] : vector<256x128xf32> to vector<128xf32>
    %51 = vector.shape_cast %50 : vector<128xf32> to vector<1x128xf32>
    %52 = arith.addf %49, %51 : vector<1x128xf32>
    %c0_25 = arith.constant 0 : index
    %c0_26 = arith.constant 0 : index
    %53 = vector.load %arg19[%c0_25, %c0_26] : memref<1x128xf32, #tpu.memory_space<vmem>>, vector<1x128xf32>
    tpu.vector_store %arg19[%c0_25, %c0_26], %52 {strides = array<i32>} : memref<1x128xf32, #tpu.memory_space<vmem>>, vector<1x128xf32>,
    %c1_i32 = arith.constant 1 : i32
    %54 = arith.cmpi eq, %arg0, %c1_i32 : i32
    %55 = arith.extui %54 : i1 to i32
    %c0_i32_27 = arith.constant 0 : i32
    %56 = arith.cmpi ne, %55, %c0_i32_27 : i32
    scf.if %56 {
      %c0_28 = arith.constant 0 : index
      %c0_29 = arith.constant 0 : index
      %57 = vector.load %arg9[%c0_28, %c0_29] : memref<16x128xf32, #tpu.memory_space<vmem>>, vector<16x128xf32>
      %c0_30 = arith.constant 0 : index
      %c0_31 = arith.constant 0 : index
      %58 = vector.load %arg19[%c0_30, %c0_31] : memref<1x128xf32, #tpu.memory_space<vmem>>, vector<1x128xf32>
      %59 = vector.broadcast %58 : vector<1x128xf32> to vector<16x128xf32>
      %60 = arith.mulf %57, %59 : vector<16x128xf32>
      %cst_32 = arith.constant dense<0.000000e+00> : vector<16xf32>
      %61 = vector.multi_reduction <add>, %60, %cst_32 [1] : vector<16x128xf32> to vector<16xf32>
      %62 = vector.shape_cast %61 : vector<16xf32> to vector<16x1xf32>
      %c0_33 = arith.constant 0 : index
      %c0_34 = arith.constant 0 : index
      %63 = vector.load %arg10[%c0_33, %c0_34] : memref<16x1xf32, #tpu.memory_space<vmem>>, vector<16x1xf32>
      %64 = arith.mulf %62, %63 : vector<16x1xf32>
      %65 = math.sqrt %64 : vector<16x1xf32>
      %cst_35 = arith.constant 0.000000e+00 : f32
      %66 = vector.broadcast %cst_35 : f32 to vector<16x1xf32>
      %67 = arith.cmpf oeq, %65, %66 : vector<16x1xf32>
      %cst_36 = arith.constant 0.00999999977 : f32
      %68 = vector.broadcast %cst_36 : f32 to vector<16x1xf32>
      %69 = arith.select %67, %68, %65 : vector<16x1xi1>, vector<16x1xf32>
      %c0_37 = arith.constant 0 : index
      %c0_38 = arith.constant 0 : index
      %70 = vector.load %arg11[%c0_37, %c0_38] : memref<16x1xf32, #tpu.memory_space<vmem>>, vector<16x1xf32>
      %71 = arith.subf %69, %70 : vector<16x1xf32>
      %c0_39 = arith.constant 0 : index
      %c0_40 = arith.constant 0 : index
      %72 = vector.load %arg12[%c0_39, %c0_40] : memref<16x1xf32, #tpu.memory_space<vmem>>, vector<16x1xf32>
      %c0_41 = arith.constant 0 : index
      %c0_42 = arith.constant 0 : index
      %73 = vector.load %arg11[%c0_41, %c0_42] : memref<16x1xf32, #tpu.memory_space<vmem>>, vector<16x1xf32>
      %74 = arith.subf %72, %73 : vector<16x1xf32>
      %cst_43 = arith.constant 1.000000e-16 : f32
      %75 = vector.broadcast %cst_43 : f32 to vector<16x1xf32>
      %76 = arith.addf %74, %75 : vector<16x1xf32>
      %77 = arith.divf %71, %76 : vector<16x1xf32>
      %c0_44 = arith.constant 0 : index
      %c0_45 = arith.constant 0 : index
      %78 = vector.load %arg13[%c0_44, %c0_45] : memref<16x16xf32, #tpu.memory_space<vmem>>, vector<16x16xf32>
      %79 = vector.broadcast %77 : vector<16x1xf32> to vector<16x16xf32>
      %80 = arith.mulf %79, %78 : vector<16x16xf32>
      %cst_46 = arith.constant dense<0.000000e+00> : vector<16xf32>
      %81 = vector.multi_reduction <add>, %80, %cst_46 [0] : vector<16x16xf32> to vector<16xf32>
      %82 = vector.shape_cast %81 : vector<16xf32> to vector<1x16xf32>
      %c0_47 = arith.constant 0 : index
      %c0_48 = arith.constant 0 : index
      %83 = vector.load %arg14[%c0_47, %c0_48] : memref<1x16xf32, #tpu.memory_space<vmem>>, vector<1x16xf32>
      %84 = arith.addf %82, %83 : vector<1x16xf32>
      %85 = arith.negf %84 : vector<1x16xf32>
      %86 = math.exp %85 : vector<1x16xf32>
      %cst_49 = arith.constant 1.000000e+00 : f32
      %87 = vector.broadcast %cst_49 : f32 to vector<1x16xf32>
      %88 = arith.addf %87, %86 : vector<1x16xf32>
      %89 = arith.divf %87, %88 : vector<1x16xf32>
      %c0_50 = arith.constant 0 : index
      %c0_51 = arith.constant 0 : index
      %90 = vector.load %arg15[%c0_50, %c0_51] : memref<16x16xf32, #tpu.memory_space<vmem>>, vector<16x16xf32>
      %91 = vector.broadcast %89 : vector<1x16xf32> to vector<16x16xf32>
      %92 = arith.mulf %90, %91 : vector<16x16xf32>
      %cst_52 = arith.constant dense<0.000000e+00> : vector<16xf32>
      %93 = vector.multi_reduction <add>, %92, %cst_52 [1] : vector<16x16xf32> to vector<16xf32>
      %94 = vector.shape_cast %93 : vector<16xf32> to vector<16x1xf32>
      %c0_53 = arith.constant 0 : index
      %c0_54 = arith.constant 0 : index
      %95 = vector.load %arg16[%c0_53, %c0_54] : memref<16x1xf32, #tpu.memory_space<vmem>>, vector<16x1xf32>
      %96 = arith.addf %94, %95 : vector<16x1xf32>
      %97 = arith.negf %96 : vector<16x1xf32>
      %98 = math.exp %97 : vector<16x1xf32>
      %cst_55 = arith.constant 1.000000e+00 : f32
      %99 = vector.broadcast %cst_55 : f32 to vector<16x1xf32>
      %100 = arith.addf %99, %98 : vector<16x1xf32>
      %101 = arith.divf %99, %100 : vector<16x1xf32>
      %c0_56 = arith.constant 0 : index
      %c0_57 = arith.constant 0 : index
      %102 = vector.load %arg17[%c0_56, %c0_57] : memref<16x1xf32, #tpu.memory_space<vmem>>, vector<16x1xf32>
      tpu.vector_store %arg17[%c0_56, %c0_57], %101 {strides = array<i32>} : memref<16x1xf32, #tpu.memory_space<vmem>>, vector<16x1xf32>,
      %c0_58 = arith.constant 0 : index
      %c0_59 = arith.constant 0 : index
      %103 = vector.load %arg18[%c0_58, %c0_59] : memref<16x1xf32, #tpu.memory_space<vmem>>, vector<16x1xf32>
      tpu.vector_store %arg18[%c0_58, %c0_59], %77 {strides = array<i32>} : memref<16x1xf32, #tpu.memory_space<vmem>>, vector<16x1xf32>,
    } else {
    }
    return
  }
  func.func @transform_0(%arg0: i32) -> (i32, i32) {
    %c0_i32 = arith.constant 0 : i32
    %c0_i32_0 = arith.constant 0 : i32
    return %arg0, %c0_i32 : i32, i32
  }
  func.func @transform_1(%arg0: i32) -> (i32, i32) {
    %c0_i32 = arith.constant 0 : i32
    %c0_i32_0 = arith.constant 0 : i32
    %c0_i32_1 = arith.constant 0 : i32
    return %c0_i32, %c0_i32_0 : i32, i32
  }
  func.func @transform_2(%arg0: i32) -> (i32, i32) {
    %c0_i32 = arith.constant 0 : i32
    %c0_i32_0 = arith.constant 0 : i32
    %c0_i32_1 = arith.constant 0 : i32
    return %c0_i32, %c0_i32_0 : i32, i32
  }
  func.func @transform_3(%arg0: i32) -> (i32, i32) {
    %c0_i32 = arith.constant 0 : i32
    %c0_i32_0 = arith.constant 0 : i32
    %c0_i32_1 = arith.constant 0 : i32
    return %c0_i32, %c0_i32_0 : i32, i32
  }
  func.func @transform_4(%arg0: i32) -> (i32, i32) {
    %c0_i32 = arith.constant 0 : i32
    %c0_i32_0 = arith.constant 0 : i32
    %c0_i32_1 = arith.constant 0 : i32
    return %c0_i32, %c0_i32_0 : i32, i32
  }
  func.func @transform_5(%arg0: i32) -> (i32, i32) {
    %c0_i32 = arith.constant 0 : i32
    %c0_i32_0 = arith.constant 0 : i32
    %c0_i32_1 = arith.constant 0 : i32
    return %c0_i32, %c0_i32_0 : i32, i32
  }
  func.func @transform_6(%arg0: i32) -> (i32, i32) {
    %c0_i32 = arith.constant 0 : i32
    %c0_i32_0 = arith.constant 0 : i32
    %c0_i32_1 = arith.constant 0 : i32
    return %c0_i32, %c0_i32_0 : i32, i32
  }
  func.func @transform_7(%arg0: i32) -> (i32, i32) {
    %c0_i32 = arith.constant 0 : i32
    %c0_i32_0 = arith.constant 0 : i32
    %c0_i32_1 = arith.constant 0 : i32
    return %c0_i32, %c0_i32_0 : i32, i32
  }
  func.func @transform_8(%arg0: i32) -> (i32, i32) {
    %c0_i32 = arith.constant 0 : i32
    %c0_i32_0 = arith.constant 0 : i32
    %c0_i32_1 = arith.constant 0 : i32
    return %c0_i32, %c0_i32_0 : i32, i32
  }
  func.func @transform_9(%arg0: i32) -> (i32, i32) {
    %c0_i32 = arith.constant 0 : i32
    %c0_i32_0 = arith.constant 0 : i32
    %c0_i32_1 = arith.constant 0 : i32
    return %c0_i32, %c0_i32_0 : i32, i32
  }
  func.func @transform_10(%arg0: i32) -> (i32, i32) {
    %c0_i32 = arith.constant 0 : i32
    %c0_i32_0 = arith.constant 0 : i32
    %c0_i32_1 = arith.constant 0 : i32
    return %c0_i32, %c0_i32_0 : i32, i32
  }
  func.func @transform_11(%arg0: i32) -> (i32, i32) {
    %c0_i32 = arith.constant 0 : i32
    %c0_i32_0 = arith.constant 0 : i32
    %c0_i32_1 = arith.constant 0 : i32
    return %c0_i32, %c0_i32_0 : i32, i32
  }
  func.func @transform_12(%arg0: i32) -> (i32, i32) {
    %c0_i32 = arith.constant 0 : i32
    %c0_i32_0 = arith.constant 0 : i32
    %c0_i32_1 = arith.constant 0 : i32
    return %c0_i32, %c0_i32_0 : i32, i32
  }
  func.func @transform_13(%arg0: i32) -> (i32, i32) {
    %c0_i32 = arith.constant 0 : i32
    %c0_i32_0 = arith.constant 0 : i32
    %c0_i32_1 = arith.constant 0 : i32
    return %c0_i32, %c0_i32_0 : i32, i32
  }
  func.func @transform_14(%arg0: i32) -> (i32, i32) {
    %c0_i32 = arith.constant 0 : i32
    %c0_i32_0 = arith.constant 0 : i32
    %c0_i32_1 = arith.constant 0 : i32
    return %c0_i32, %c0_i32_0 : i32, i32
  }
  func.func @transform_15(%arg0: i32) -> (i32, i32) {
    %c0_i32 = arith.constant 0 : i32
    %c0_i32_0 = arith.constant 0 : i32
    %c0_i32_1 = arith.constant 0 : i32
    return %c0_i32, %c0_i32_0 : i32, i32
  }
  func.func @transform_16(%arg0: i32) -> (i32, i32) {
    %c0_i32 = arith.constant 0 : i32
    %c0_i32_0 = arith.constant 0 : i32
    %c0_i32_1 = arith.constant 0 : i32
    return %c0_i32, %c0_i32_0 : i32, i32
  }
  func.func @transform_17(%arg0: i32) -> (i32, i32) {
    %c0_i32 = arith.constant 0 : i32
    %c0_i32_0 = arith.constant 0 : i32
    %c0_i32_1 = arith.constant 0 : i32
    return %c0_i32, %c0_i32_0 : i32, i32
  }
}

</mosaic_0001>

<bundles_post_ra>
// kernel: tpu_custom_call.1
= control target key start
LH: loop header
LB: loop body
LE: loop exit
PB: predicated region body
PF: predicated region fallthrough
CT: control target
= control target key end

     0   :  { %s3800_s0 = inlined_call_operand.hbm [shape: f32[512,128], index: 0, kind: input, shape index: {}]   ;;  %s3801_s1 = inlined_call_operand.vmem [shape: f32[1,128], index: 1, kind: input, shape index: {}]   ;;  %s3802_s2 = inlined_call_operand.vmem [shape: f32[1,128], index: 2, kind: input, shape index: {}]   ;;  %s3803_s3 = inlined_call_operand.hbm [shape: f32[128,128], index: 3, kind: input, shape index: {}]   ;;  %s3804_s4 = inlined_call_operand.vmem [shape: f32[1,128], index: 4, kind: input, shape index: {}]   ;;  %s3805_s5 = inlined_call_operand.hbm [shape: f32[128,128], index: 5, kind: input, shape index: {}]   ;;  %s3806_s6 = inlined_call_operand.vmem [shape: f32[1,128], index: 6, kind: input, shape index: {}]   ;;  %s3807_s7 = inlined_call_operand.vmem [shape: f32[1,128], index: 7, kind: input, shape index: {}]   ;;  %s3808_s8 = inlined_call_operand.vmem [shape: f32[16,128], index: 8, kind: input, shape index: {}]   ;;  %s3809_s9 = inlined_call_operand.vmem [shape: f32[16,1], index: 9, kind: input, shape index: {}]   ;;  %s3810_s10 = inlined_call_operand.vmem [shape: f32[16,1], index: 10, kind: input, shape index: {}]   ;;  %s3811_s11 = inlined_call_operand.vmem [shape: f32[16,1], index: 11, kind: input, shape index: {}]   ;;  %s3812_s12 = inlined_call_operand.vmem [shape: f32[16,16], index: 12, kind: input, shape index: {}]   ;;  %s3813_s13 = inlined_call_operand.vmem [shape: f32[1,16], index: 13, kind: input, shape index: {}]   ;;  %s3814_s14 = inlined_call_operand.vmem [shape: f32[16,16], index: 14, kind: input, shape index: {}]   ;;  %s3815_s15 = inlined_call_operand.vmem [shape: f32[16,1], index: 15, kind: input, shape index: {}]   ;;  %s3816_s16 = inlined_call_operand.vmem [shape: f32[16,1], index: 16, kind: output, shape index: {0}]   ;;  %s3817_s17 = inlined_call_operand.vmem [shape: f32[16,1], index: 17, kind: output, shape index: {1}]  }
   0x1   :  { %3842 = sst [smem:[#allocation23_spill]] %s3800_s0 }
   0x2   :  { %3843 = sst [smem:[#allocation24_spill]] %s3801_s1 }
   0x3   :  { %3844 = sst [smem:[#allocation25_spill]] %s3803_s3 }
   0x4   :  { %3845 = sst [smem:[#allocation26_spill]] %s3805_s5 }
   0x5   :  { %3846 = sst [smem:[#allocation27_spill]] %s3813_s13 }
   0x6   :  { %3847 = sst [smem:[#allocation28_spill]] %s3814_s14 }
   0x7   :  { %3848 = sst [smem:[#allocation29_spill]] %s3815_s15 }
   0x8   :  { %3849 = sst [smem:[#allocation30_spill]] %s3816_s16 }
   0x9   :  { %23 = vsyncpa [#allocation4], 0 }
   0xa   :  { %25 = vsyncpa [#allocation4 + $0x1], 0 }
   0xb   :  { %26 = vsyncpa [#allocation6], 0  ;;  %s3044_s24 = smov 0   ;;  %s3046_s25 = smov 0  }
   0xc   :  { %s3048_s26 = smov 0   ;;  %s3050_s27 = smov 0  }
   0xd LB: > { %s3063_s28 = sadd.s32 4294967295, %s2944_s27   ;;  %p52_p0 = scmp.ne.s32.totalorder %s2936_s25, %s2932_s24  ;;  %s2944_s27 = sphi %s3050_s27, %s3901_s27   ;;  %s2940_s26 = sphi %s3048_s26, %s3900_s26   ;;  %s2936_s25 = sphi %s3046_s25, %s3899_s25   ;;  %s2932_s24 = sphi %s3044_s24, %s3898_s24  }
   0xe   : > { %p3824_p1 = scmp.eq.s32.totalorder %s3063_s28, 0  ;;  %p2105_p2 = scmp.ge.s32.totalorder %s2944_s27, 1 }
   0xf   : > { %p420_p3 = scmp.lt.s32.totalorder %s2944_s27, 3  ;;  %s2946_s30 = smov [#allocation5]  }
  0x10   : > { %p3072_p5 = por %p3824_p1, %p52_p0  ;;  %s438_s18 = sshll.u32 %s2946_s30, 4  ;;  %s439_s18 = int_to_ptr.vmem [resolvable:$true] %s438_s18 }
  0x11   : > { %p3076_p6 = pnand %p2105_p2, %p420_p3  ;;  %s2947_s1 = smov [#allocation7]  }
  0x12   : > { %s3850_s29 = scalar_select %p3072_p5, 1, 0 }
  0x13   : > { %s3851_s0 = scalar_select %p3076_p6, 1, 0 }
  0x14   : > { %p2491_p7 = pneg %p3076_p6  ;;  %s454_s20 = sshll.u32 %s2947_s1, 4  ;;  %s455_s20 = int_to_ptr.vmem [resolvable:$true] %s454_s20 }
  0x15   : > { %s2837_s21 = scalar_lea.vmem %s439_s18, 2048  ;;  %p2845_p13 = scmp.lt.s32.totalorder %s439_s18, %s439_s18 }
  0x16   : > { %p3084_p8 = pnand %p2491_p7, %p3824_p1  ;;  %p2838_p10 = scmp.ne.s32.totalorder %s439_s18, %s2837_s21 }
  0x17   : > { %p2846_p0 = scmp.lt.s32.totalorder %s2837_s21, %s2837_s21 }
  0x18   : > { %p2828_p9 = pneg %p3084_p8 }
  0x19   : > { %p2847_p2 = por %p2846_p0, %p2845_p13 }
  0x1a   : > { %p2840_p11 = pnand %p2838_p10, %p2828_p9 }
  0x1c   : > { %p2841_p12 = pneg %p2840_p11 }
  0x1e   : > { %p2848_p3 = pnand %p2847_p2, %p2841_p12 }
  0x20   : > { %2851 = shalt.err (!%p2848_p3)
}
  0x21   : > { %s3822_s22 = smov 128   ;;  %s3823_s23 = smov 8  }
  0x22   : > { %s3853_s3 = sld [smem:[#allocation25_spill]]  ;;  %s2863_s1 = scalar_lea.vmem %s455_s20, 2048 }
  0x23   : > { %p2864_p7 = scmp.ne.s32.totalorder %s455_s20, %s2863_s1  ;;  %p2871_p12 = scmp.lt.s32.totalorder %s455_s20, %s455_s20 }
  0x24   : > { %p2872_p13 = scmp.lt.s32.totalorder %s2863_s1, %s2863_s1 }
  0x25   : > { %p2866_p10 = pnand %p2864_p7, %p2828_p9 }
  0x26   : > { %p2873_p0 = por %p2872_p13, %p2871_p12 }
  0x27   : > { %p2867_p11 = pneg %p2866_p10 }
  0x28   : > { %2494 = dma.hbm_to_vmem [thread:$0]  (!%p3084_p8), %s3853_s3, 2048, %s439_s18, [#allocation6], %s3822_s22, %s3822_s22, %s3823_s23  }
  0x29   : > { %p2874_p2 = pnand %p2873_p0, %p2867_p11 }
  0x2b   : > { %2877 = shalt.err (!%p2874_p2)
}
  0x2c   : > { %s3854_s5 = sld [smem:[#allocation26_spill]]  ;;  %s3113_s18 = sadd.s32 1, %s2944_s27  }
  0x2d   : > { %s39_s19 = sadd.s32 1, %s2940_s26  ;;  %s36_s24 = ssub.s32 %s2944_s27, %s3113_s18 }
  0x2e   : > { %p46_p9 = scmp.ne.s32.totalorder %s2940_s26, %s2936_s25  ;;  %p37_p3 = scmp.eq.s32.totalorder %s36_s24, 0 }
  0x2f   : > { %p47_p7 = scmp.eq.s32.totalorder %s2944_s27, 0  ;;  %p2504_p10 = scmp.lt.s32.totalorder %s2944_s27, 2 }
  0x30   : > { %s498_s16 = sand.u32 1, %s2940_s26   ;;  %s2224_s21 = sshll.u32 %s2944_s27, 12 }
  0x31   : > { %s3124_s30 = scalar_select %p37_p3, %s2940_s26, %s39_s19  }
  0x32   : > { %2497 = dma.hbm_to_vmem [thread:$0]  (!%p3084_p8), %s3854_s5, 2048, %s455_s20, [#allocation6], %s3822_s22, %s3822_s22, %s3823_s23  }
  0x33   : > { %p48_p11 = por %p47_p7, %p46_p9  ;;  %s2109_s1 = sshll.u32 %s498_s16, 8 }
  0x34   : > { %s3855_s14 = sld [smem:[#allocation23_spill]]  ;;  %s502_s20 = scalar_lea.vmem [#allocation3], %s2109_s1 }
  0x35   : > { %s509_s22 = sshll.u32 %s502_s20, 4  ;;  %p3132_p8 = pnand %p2504_p10, %p48_p11  ;;  %s3136_s22 = int_to_ptr.vmem [resolvable:$true] %s509_s22 }
  0x36   : > { %s3138_s19 = scalar_lea.sflag [#allocation4], %s498_s16 }
  0x37   : > { %p2880_p13 = pneg %p3132_p8 }
  0x3a   : > { %s3130_s13 = scalar_lea.hbm %s3855_s14, %s2224_s21  ;;  %s2883_s1 = scalar_lea.hbm %s3855_s14, 8192 }
  0x3b   : > { %s2878_s27 = scalar_lea.hbm %s3130_s13, 4096  ;;  %p2884_p9 = scmp.lt.s32.totalorder %s3130_s13, %s3855_s14 }
  0x3c   : > { %p2879_p12 = scmp.ne.s32.totalorder %s3130_s13, %s2878_s27  ;;  %p2885_p3 = scmp.lt.s32.totalorder %s2883_s1, %s2878_s27 }
  0x3e   : > { %p2881_p0 = pnand %p2880_p13, %p2879_p12  ;;  %p2886_p7 = por %p2885_p3, %p2884_p9 }
  0x40   : > { %p2882_p2 = pneg %p2881_p0 }
  0x42   : > { %p2887_p10 = pnand %p2886_p7, %p2882_p2 }
  0x44   : > { %2890 = shalt.err (!%p2887_p10)
}
  0x45   : > { %s2891_s16 = scalar_lea.vmem %s3136_s22, 4096  ;;  %s2950_s23 = smov [#allocation3]  }
  0x46   : > { %p2892_p11 = scmp.ne.s32.totalorder %s3136_s22, %s2891_s16  ;;  %s2896_s5 = sshll.u32 %s2950_s23, 4  ;;  %s2897_s5 = int_to_ptr.vmem [resolvable:$false] %s2896_s5 }
  0x47   : > { %s2898_s3 = scalar_lea.vmem %s2897_s5, 8192  ;;  %p2899_p0 = scmp.lt.s32.totalorder %s3136_s22, %s2897_s5 }
  0x48   : > { %p2894_p4 = pnand %p2892_p11, %p2880_p13  ;;  %p2900_p1 = scmp.lt.s32.totalorder %s2898_s3, %s2891_s16 }
  0x4a   : > { %p2895_p12 = pneg %p2894_p4  ;;  %p2901_p5 = por %p2900_p1, %p2899_p0 }
  0x4c   : > { %p2902_p6 = pnand %p2901_p5, %p2895_p12 }
  0x4e   : > { %2905 = shalt.err (!%p2902_p6)
}
  0x4f   : > { %s3857_s27 = smov 8   ;;  %s3858_s15 = smov 128  }
  0x50   : > { %2501 = dma.hbm_to_vmem [thread:$0]  (!%p3132_p8), %s3130_s13, 4096, %s3136_s22, %s3138_s19, %s3858_s15, %s3858_s15, %s3857_s27  }
  0x51   : > { %p3859_p4 = scmp.ne.s32.totalorder %s3851_s0, 0 }
  0x53   : > { %521 = sbr.rel (%p3859_p4) target bundleno = 1230 (0x4ce), region = 84 }
  0x58   : > { %s523_s23 = sand.u32 1, %s2936_s25   ;;  %p3860_p1 = scmp.ne.s32.totalorder %s3850_s29, 0 }
  0x59   : > { %s2113_s5 = sshll.u32 %s523_s23, 8  ;;  %s524_s1 = scalar_lea.sflag [#allocation4], %s523_s23 }
  0x5a   : > { %s3165_s21 = scalar_lea.vmem [#allocation3], %s2113_s5 }
  0x5b   : > { %2923 = dma.done.wait (%p3860_p1), %s524_s1, 4096  }
  0x5c   : > { %2925 = vsyncadd (%p3860_p1), %s524_s1, 4294963200  ;;  %p3861_p5 = scmp.eq.s32.totalorder %s3063_s28, 0 }
  0x5e   : > { %2927 = dma.done.wait (%p3861_p5), [#allocation6], 4096   ;;  %p3862_p6 = pmov %p3861_p5 }
  0x5f   : > { %p3863_p8 = scmp.ne.s32.totalorder %s3063_s28, 0 }
  0x60   : > { %2929 = vsyncadd (%p3862_p6), [#allocation6], 4294963200 }
  0x61   : > { %585 = sbr.rel (%p3863_p8) target bundleno = 104 (0x68), region = 100 }
  0x66   : > { %v2951_v0 = vmov 0.0  }
  0x67   : > { %586 = vst [vmem:[#allocation2] sm:$0x1] %v2951_v0 }
  0x68 PF: > { %v878_v1 = vld [vmem:[#allocation5 + $0x78] sm:$0xff]  ;;  %v877_v2 = vld [vmem:[#allocation5 + $0x70] sm:$0xff]  ;;  %v621_v3 = vlaneseq  ;;  %v876_v4 = vld [vmem:[#allocation5 + $0x68] sm:$0xff]  ;;  %s3864_s0 = sld [smem:[#allocation24_spill]]  ;;  %s2117_s27 = sshll.u32 %s3063_s28, 8 }
  0x69   : > { %2321 = vmatprep.subr.mxu0 %v878_v1  ;;  %v875_v6 = vld [vmem:[#allocation5 + $0x60] sm:$0xff]  ;;  %v874_v8 = vld [vmem:[#allocation5 + $0x58] sm:$0xff]  ;;  %v873_v12 = vld [vmem:[#allocation5 + $0x50] sm:$0xff]  ;;  %p2217_p13 = scmp.ne.s32.totalorder %s3063_s28, 1 }
  0x6a   : > { %2322 = vmatpush3.msra.mxu0 %v878_v1  ;;  %v3177_v5 = vshrl.u32 %v621_v3, 7  ;;  %v658_v9 = vld [vmem:[%s3802_s2] sm:$0x1]  ;;  %v872_v14 = vld [vmem:[#allocation5 + $0x48] sm:$0xff]  ;;  %v871_v16 = vld [vmem:[#allocation5 + $0x40] sm:$0xff]  ;;  %s3891_s20 = sld [smem:[#allocation27_spill]] (!%p2217_p13) }
  0x6b   : > { %2323 = vmatprep.subr.mxu0 %v877_v2  ;;  %v870_v17 = vld [vmem:[#allocation5 + $0x38] sm:$0xff]  ;;  %v869_v18 = vld [vmem:[#allocation5 + $0x30] sm:$0xff]  ;;  %v868_v19 = vld [vmem:[#allocation5 + $0x28] sm:$0xff]  ;;  %s3895_s13 = sld [smem:[#allocation29_spill]] (!%p2217_p13) }
  0x6c   : > { %2324 = vmatpush3.msra.mxu0 %v877_v2  ;;  %v3186_v10 = vsub.s32 0, %v3177_v5  ;;  %v867_v21 = vld [vmem:[#allocation5 + $0x20] sm:$0xff]  ;;  %v866_v23 = vld [vmem:[#allocation5 + $0x18] sm:$0xff]  ;;  %v588_v24 = vld [vmem:[%s3165_s21 + $0x8] sm:$0xff]  ;;  %s3896_s24 = sld [smem:[#allocation30_spill]] (!%p2217_p13) }
  0x6d   : > { %2325 = vmatprep.subr.mxu0 %v876_v4  ;;  %v587_v22 = vld [vmem:[%s3165_s21] sm:$0xff]  ;;  %v589_v26 = vld [vmem:[%s3165_s21 + $0x10] sm:$0xff]  ;;  %v864_v30 = vld [vmem:[#allocation5 + $0x8] sm:$0xff] }
  0x6e   : > { %v619_v7 = vld [vmem:[%s3864_s0] sm:$0x1]  ;;  %2326 = vmatpush3.msra.mxu0 %v876_v4  ;;  %3865 = vst [vmem:[#allocation10_spill] sm:$0xff] %v3186_v10  ;;  %v865_v27 = vld [vmem:[#allocation5 + $0x10] sm:$0xff]  ;;  %v591_v34 = vld [vmem:[%s3165_s21 + $0x20] sm:$0xff] }
  0x6f   : > { %2327 = vmatprep.subr.mxu0 %v875_v6  ;;  %v659_v11 = vsub.f32 %v658_v9, %v619_v7  ;;  %v3190_v20 = vrot.slane %v619_v7, %v3186_v10  ;;  %v590_v32 = vld [vmem:[%s3165_s21 + $0x18] sm:$0xff]  ;;  %v863_v35 = vld [vmem:[#allocation5] sm:$0xff]  ;;  %v592_v41 = vld [vmem:[%s3165_s21 + $0x28] sm:$0xff] }
  0x70   : > { %2328 = vmatpush3.msra.mxu0 %v875_v6  ;;  %v618_v36 = vld [vmem:[%s3165_s21 + $0xf8] sm:$0xff]  ;;  %v593_v42 = vld [vmem:[%s3165_s21 + $0x30] sm:$0xff]  ;;  %v595_v49 = vld [vmem:[%s3165_s21 + $0x40] sm:$0xff] }
  0x71   : > { %2329 = vmatprep.subr.mxu0 %v874_v8  ;;  %v660_v13 = vadd.f32 1e-16, %v659_v11  ;;  %v626_v25 = vsub.f32 %v587_v22, %v3190_v20  ;;  %v627_v28 = vsub.f32 %v588_v24, %v3190_v20  ;;  %v628_v31 = vsub.f32 %v589_v26, %v3190_v20  ;;  %v594_v48 = vld [vmem:[%s3165_s21 + $0x38] sm:$0xff]  ;;  %v596_v55 = vld [vmem:[%s3165_s21 + $0x48] sm:$0xff]  ;;  %v597_v56 = vld [vmem:[%s3165_s21 + $0x50] sm:$0xff] }
  0x72   : > { %2330 = vmatpush3.msra.mxu0 %v874_v8  ;;  %v629_v38 = vsub.f32 %v590_v32, %v3190_v20  ;;  %v630_v40 = vsub.f32 %v591_v34, %v3190_v20  ;;  %v657_v43 = vsub.f32 %v618_v36, %v3190_v20  ;;  %v631_v45 = vsub.f32 %v592_v41, %v3190_v20  ;;  %v598_v61 = vld [vmem:[%s3165_s21 + $0x58] sm:$0xff]  ;;  %v599_v62 = vld [vmem:[%s3165_s21 + $0x60] sm:$0xff]  ;;  %v600_v3 = vld [vmem:[%s3165_s21 + $0x68] sm:$0xff]  ;;  %s3897_s19 = smov (!%p2217_p13), %s3896_s24 }
  0x73   : > { %2331 = vmatprep.subr.mxu0 %v873_v12  ;;  %v665_v15 = vrot.slane %v660_v13, %v3186_v10  ;;  %v632_v47 = vsub.f32 %v593_v42, %v3190_v20  ;;  %v633_v52 = vsub.f32 %v594_v48, %v3190_v20  ;;  %v634_v54 = vsub.f32 %v595_v49, %v3190_v20  ;;  %v601_v4 = vld [vmem:[%s3165_s21 + $0x70] sm:$0xff]  ;;  %v602_v11 = vld [vmem:[%s3165_s21 + $0x78] sm:$0xff]  ;;  %v611_v41 = vld [vmem:[%s3165_s21 + $0xc0] sm:$0xff] }
  0x74   : > { %2332 = vmatpush3.msra.mxu0 %v873_v12  ;;  %v635_v58 = vsub.f32 %v596_v55, %v3190_v20  ;;  %v636_v60 = vsub.f32 %v597_v56, %v3190_v20  ;;  %v637_v0 = vsub.f32 %v598_v61, %v3190_v20  ;;  %v638_v2 = vsub.f32 %v599_v62, %v3190_v20  ;;  %v603_v12 = vld [vmem:[%s3165_s21 + $0x80] sm:$0xff]  ;;  %v606_v24 = vld [vmem:[%s3165_s21 + $0x98] sm:$0xff]  ;;  %v609_v32 = vld [vmem:[%s3165_s21 + $0xb0] sm:$0xff] }
  0x75   : > { %2333 = vmatprep.subr.mxu0 %v872_v14  ;;  %2546 = vrcp.f32 %v665_v15  ;;  %v639_v7 = vsub.f32 %v600_v3, %v3190_v20  ;;  %v640_v9 = vsub.f32 %v601_v4, %v3190_v20  ;;  %v612_v48 = vld [vmem:[%s3165_s21 + $0xc8] sm:$0xff]  ;;  %v613_v49 = vld [vmem:[%s3165_s21 + $0xd0] sm:$0xff] }
  0x76   : > { %2334 = vmatpush3.msra.mxu0 %v872_v14  ;;  %v641_v14 = vsub.f32 %v602_v11, %v3190_v20  ;;  %v652_v56 = vsub.f32 %v613_v49, %v3190_v20  ;;  %v616_v3 = vld [vmem:[%s3165_s21 + $0xe8] sm:$0xff]  ;;  %v617_v4 = vld [vmem:[%s3165_s21 + $0xf0] sm:$0xff] }
  0x77   : > { %2335 = vmatprep.subr.mxu0 %v871_v16 }
  0x78   : > { %2336 = vmatpush3.msra.mxu0 %v871_v16  ;;  %v642_v16 = vsub.f32 %v603_v12, %v3190_v20  ;;  %v656_v12 = vsub.f32 %v617_v4, %v3190_v20 }
  0x79   : > { %2337 = vmatprep.subr.mxu0 %v870_v17 }
  0x7a   : > { %2338 = vmatpush3.msra.mxu0 %v870_v17  ;;  %v604_v17 = vld [vmem:[%s3165_s21 + $0x88] sm:$0xff] }
  0x7b   : > { %2339 = vmatprep.subr.mxu0 %v869_v18 }
  0x7c   : > { %2340 = vmatpush3.msra.mxu0 %v869_v18  ;;  %v605_v18 = vld [vmem:[%s3165_s21 + $0x90] sm:$0xff] }
  0x7d   : > { %2341 = vmatprep.subr.mxu0 %v868_v19 }
  0x7e   : > { %2342 = vmatpush3.msra.mxu0 %v868_v19 }
  0x7f   : > { %2343 = vmatprep.subr.mxu0 %v867_v21 }
  0x80   : > { %2344 = vmatpush3.msra.mxu0 %v867_v21  ;;  %v643_v21 = vsub.f32 %v604_v17, %v3190_v20  ;;  %v1318_v17 = vld [vmem:[#allocation7 + $0x78] sm:$0xff] }
  0x81   : > { %2345 = vmatprep.subr.mxu0 %v866_v23  ;;  %2401 = vmatprep.subr.mxu1 %v1318_v17 }
  0x82   : > { %v3197_v29 = vpop.eup %2546  ;;  %2346 = vmatpush3.msra.mxu0 %v866_v23  ;;  %v644_v23 = vsub.f32 %v605_v18, %v3190_v20  ;;  %2402 = vmatpush3.msra.mxu1 %v1318_v17  ;;  %v1316_v18 = vld [vmem:[#allocation7 + $0x68] sm:$0xff] }
  0x83   : > { %2347 = vmatprep.subr.mxu0 %v865_v27  ;;  %v3202_v33 = vmul.f32 %v3197_v29, %v626_v25  ;;  %v3208_v37 = vmul.f32 %v3197_v29, %v627_v28  ;;  %v3212_v39 = vmul.f32 %v3197_v29, %v628_v31  ;;  %v3220_v44 = vmul.f32 %v3197_v29, %v629_v38  ;;  %v607_v25 = vld [vmem:[%s3165_s21 + $0xa0] sm:$0xff]  ;;  %v608_v31 = vld [vmem:[%s3165_s21 + $0xa8] sm:$0xff] }
  0x84   : > { %2348 = vmatpush3.msra.mxu0 %v865_v27  ;;  %v3225_v46 = vmul.f32 %v3197_v29, %v630_v40  ;;  %v3231_v50 = vmul.f32 %v3197_v29, %v657_v43  ;;  %v3235_v51 = vmul.f32 %v3197_v29, %v631_v45  ;;  %v3240_v53 = vmul.f32 %v3197_v29, %v632_v47  ;;  %v610_v40 = vld [vmem:[%s3165_s21 + $0xb8] sm:$0xff] }
  0x85   : > { %2349 = vmatprep.subr.mxu0 %v864_v30  ;;  %2353 = vmatprep.mubr.f32.mxu0 %v3202_v33  ;;  %v3247_v57 = vmul.f32 %v3197_v29, %v633_v52  ;;  %v3252_v59 = vmul.f32 %v3197_v29, %v634_v54  ;;  %v3259_v63 = vmul.f32 %v3197_v29, %v635_v58  ;;  %v614_v58 = vld [vmem:[%s3165_s21 + $0xd8] sm:$0xff] }
  0x86   : > { %2350 = vmatpush3.msra.mxu0 %v864_v30  ;;  %3866 = vst [vmem:[#allocation11_spill] sm:$0xff] %v3231_v50  ;;  %v3264_v1 = vmul.f32 %v3197_v29, %v636_v60  ;;  %v3271_v6 = vmul.f32 %v3197_v29, %v637_v0  ;;  %v3276_v8 = vmul.f32 %v3197_v29, %v638_v2  ;;  %v615_v60 = vld [vmem:[%s3165_s21 + $0xe0] sm:$0xff] }
  0x87   : > { %2351 = vmatprep.subr.mxu0 %v863_v35  ;;  %v3283_v13 = vmul.f32 %v3197_v29, %v639_v7  ;;  %v3288_v15 = vmul.f32 %v3197_v29, %v640_v9  ;;  %v3295_v19 = vmul.f32 %v3197_v29, %v641_v14  ;;  %v3300_v22 = vmul.f32 %v3197_v29, %v642_v16 }
  0x88   : > { %2352 = vmatpush3.msra.mxu0 %v863_v35  ;;  %v3307_v26 = vmul.f32 %v3197_v29, %v643_v21  ;;  %v645_v27 = vsub.f32 %v606_v24, %v3190_v20  ;;  %v3312_v28 = vmul.f32 %v3197_v29, %v644_v23  ;;  %v646_v30 = vsub.f32 %v607_v25, %v3190_v20  ;;  %v1315_v21 = vld [vmem:[#allocation7 + $0x60] sm:$0xff]  ;;  %v1313_v23 = vld [vmem:[#allocation7 + $0x50] sm:$0xff]  ;;  %v1312_v24 = vld [vmem:[#allocation7 + $0x48] sm:$0xff] }
  0x89   : > { %2354 = vmatmul.mubr.f32.vlgmr.msra.gmra.mxu0 %v3208_v37  ;;  %v647_v35 = vsub.f32 %v608_v31, %v3190_v20  ;;  %v648_v38 = vsub.f32 %v609_v32, %v3190_v20  ;;  %v649_v43 = vsub.f32 %v610_v40, %v3190_v20  ;;  %v650_v47 = vsub.f32 %v611_v41, %v3190_v20  ;;  %v1311_v25 = vld [vmem:[#allocation7 + $0x40] sm:$0xff]  ;;  %v1308_v31 = vld [vmem:[#allocation7 + $0x28] sm:$0xff] }
  0x8a   : > { %2356 = vmatprep.mubr.f32.mxu0 %v3212_v39  ;;  %v3319_v34 = vmul.f32 %v3197_v29, %v645_v27  ;;  %v3324_v36 = vmul.f32 %v3197_v29, %v646_v30  ;;  %v651_v54 = vsub.f32 %v612_v48, %v3190_v20  ;;  %v653_v62 = vsub.f32 %v614_v58, %v3190_v20  ;;  %v1310_v27 = vld [vmem:[#allocation7 + $0x38] sm:$0xff]  ;;  %v1309_v30 = vld [vmem:[#allocation7 + $0x30] sm:$0xff]  ;;  %v1307_v32 = vld [vmem:[#allocation7 + $0x20] sm:$0xff] }
  0x8b   : > { %v3331_v42 = vmul.f32 %v3197_v29, %v647_v35  ;;  %v3336_v45 = vmul.f32 %v3197_v29, %v648_v38  ;;  %v3343_v52 = vmul.f32 %v3197_v29, %v649_v43  ;;  %v3348_v55 = vmul.f32 %v3197_v29, %v650_v47  ;;  %v1306_v35 = vld [vmem:[#allocation7 + $0x18] sm:$0xff]  ;;  %v1305_v38 = vld [vmem:[#allocation7 + $0x10] sm:$0xff]  ;;  %v1304_v40 = vld [vmem:[#allocation7 + $0x8] sm:$0xff] }
  0x8c   : > { %3867 = vst [vmem:[#allocation12_spill] sm:$0xff] %v3324_v36  ;;  %v3355_v61 = vmul.f32 %v3197_v29, %v651_v54  ;;  %v3360_v0 = vmul.f32 %v3197_v29, %v652_v56  ;;  %v654_v2 = vsub.f32 %v615_v60, %v3190_v20  ;;  %v3367_v7 = vmul.f32 %v3197_v29, %v653_v62  ;;  %v1303_v41 = vld [vmem:[#allocation7] sm:$0xff]  ;;  %v3389_v43 = vld [vmem:[%s3804_s4] ss:$0 sm:$0xff] }
  0x8d   : > { %2357 = vmatmul.mubr.f32.gmra.mxu0 %v3220_v44  ;;  %3868 = vst [vmem:[#allocation13_spill] sm:$0xff] %v3331_v42  ;;  %3869 = vst [vmem:[#allocation14_spill] sm:$0xff] %v3336_v45  ;;  %v655_v9 = vsub.f32 %v616_v3, %v3190_v20  ;;  %v3381_v16 = vmul.f32 %v3197_v29, %v656_v12  ;;  %v1317_v20 = vld [vmem:[#allocation7 + $0x70] sm:$0xff] }
  0x8e   : > { %2359 = vmatprep.mubr.f32.mxu0 %v3225_v46  ;;  %3870 = vst [vmem:[#allocation15_spill] sm:$0xff] %v3343_v52  ;;  %3871 = vst [vmem:[#allocation16_spill] sm:$0xff] %v3348_v55  ;;  %v3372_v11 = vmul.f32 %v3197_v29, %v654_v2  ;;  %2403 = vmatprep.subr.mxu1 %v1317_v20 }
  0x8f   : > { %3872 = vst [vmem:[#allocation17_spill] sm:$0xff] %v3355_v61  ;;  %3873 = vst [vmem:[#allocation18_spill] sm:$0xff] %v3360_v0  ;;  %v3377_v14 = vmul.f32 %v3197_v29, %v655_v9  ;;  %2404 = vmatpush3.msra.mxu1 %v1317_v20  ;;  %v1314_v29 = vld [vmem:[#allocation7 + $0x58] sm:$0xff] }
  0x90   : > { %3874 = vst [vmem:[#allocation19_spill] sm:$0xff] %v3367_v7  ;;  %3875 = vst [vmem:[#allocation20_spill] sm:$0xff] %v3372_v11  ;;  %2405 = vmatprep.subr.mxu1 %v1316_v18 }
  0x91   : > { %2360 = vmatmul.mubr.f32.gmra.mxu0 %v3235_v51  ;;  %3876 = vst [vmem:[#allocation21_spill] sm:$0xff] %v3377_v14  ;;  %3877 = vst [vmem:[#allocation22_spill] sm:$0xff] %v3381_v16  ;;  %2406 = vmatpush3.msra.mxu1 %v1316_v18 }
  0x92   : > { %2362 = vmatprep.mubr.f32.mxu0 %v3240_v53  ;;  %2407 = vmatprep.subr.mxu1 %v1315_v21 }
  0x93   : > { %2408 = vmatpush3.msra.mxu1 %v1315_v21 }
  0x94   : > { %2409 = vmatprep.subr.mxu1 %v1314_v29 }
  0x95   : > { %2363 = vmatmul.mubr.f32.gmra.mxu0 %v3247_v57  ;;  %2410 = vmatpush3.msra.mxu1 %v1314_v29 }
  0x96   : > { %2365 = vmatprep.mubr.f32.mxu0 %v3252_v59  ;;  %2411 = vmatprep.subr.mxu1 %v1313_v23 }
  0x97   : > { %2412 = vmatpush3.msra.mxu1 %v1313_v23 }
  0x98   : > { %2413 = vmatprep.subr.mxu1 %v1312_v24 }
  0x99   : > { %2366 = vmatmul.mubr.f32.gmra.mxu0 %v3259_v63  ;;  %2414 = vmatpush3.msra.mxu1 %v1312_v24 }
  0x9a   : > { %2368 = vmatprep.mubr.f32.mxu0 %v3264_v1  ;;  %2415 = vmatprep.subr.mxu1 %v1311_v25 }
  0x9b   : > { %2416 = vmatpush3.msra.mxu1 %v1311_v25 }
  0x9c   : > { %2417 = vmatprep.subr.mxu1 %v1310_v27 }
  0x9d   : > { %2369 = vmatmul.mubr.f32.gmra.mxu0 %v3271_v6  ;;  %2418 = vmatpush3.msra.mxu1 %v1310_v27 }
  0x9e   : > { %2371 = vmatprep.mubr.f32.mxu0 %v3276_v8  ;;  %2419 = vmatprep.subr.mxu1 %v1309_v30 }
  0x9f   : > { %2420 = vmatpush3.msra.mxu1 %v1309_v30 }
  0xa0   : > { %2421 = vmatprep.subr.mxu1 %v1308_v31 }
  0xa1   : > { %2372 = vmatmul.mubr.f32.gmra.mxu0 %v3283_v13  ;;  %2422 = vmatpush3.msra.mxu1 %v1308_v31 }
  0xa2   : > { %2374 = vmatprep.mubr.f32.mxu0 %v3288_v15  ;;  %2423 = vmatprep.subr.mxu1 %v1307_v32 }
  0xa3   : > { %2424 = vmatpush3.msra.mxu1 %v1307_v32 }
  0xa4   : > { %2425 = vmatprep.subr.mxu1 %v1306_v35 }
  0xa5   : > { %2375 = vmatmul.mubr.f32.gmra.mxu0 %v3295_v19  ;;  %2426 = vmatpush3.msra.mxu1 %v1306_v35 }
  0xa6   : > { %2377 = vmatprep.mubr.f32.mxu0 %v3300_v22  ;;  %2427 = vmatprep.subr.mxu1 %v1305_v38 }
  0xa7   : > { %2428 = vmatpush3.msra.mxu1 %v1305_v38 }
  0xa8   : > { %2429 = vmatprep.subr.mxu1 %v1304_v40 }
  0xa9   : > { %2378 = vmatmul.mubr.f32.gmra.mxu0 %v3307_v26  ;;  %2430 = vmatpush3.msra.mxu1 %v1304_v40 }
  0xaa   : > { %2380 = vmatprep.mubr.f32.mxu0 %v3312_v28  ;;  %2431 = vmatprep.subr.mxu1 %v1303_v41 }
  0xab   : > { %2432 = vmatpush3.msra.mxu1 %v1303_v41 }
  0xad   : > { %2381 = vmatmul.mubr.f32.gmra.mxu0 %v3319_v34 }
  0xae   : > { %2383 = vmatprep.mubr.f32.mxu0 %v3324_v36 }
  0xb1   : > { %2384 = vmatmul.mubr.f32.gmra.mxu0 %v3331_v42 }
  0xb2   : > { %2386 = vmatprep.mubr.f32.mxu0 %v3336_v45 }
  0xb5   : > { %2387 = vmatmul.mubr.f32.gmra.mxu0 %v3343_v52 }
  0xb6   : > { %2389 = vmatprep.mubr.f32.mxu0 %v3348_v55 }
  0xb9   : > { %2390 = vmatmul.mubr.f32.gmra.mxu0 %v3355_v61 }
  0xba   : > { %2392 = vmatprep.mubr.f32.mxu0 %v3360_v0 }
  0xbd   : > { %2393 = vmatmul.mubr.f32.gmra.mxu0 %v3367_v7 }
  0xbe   : > { %2395 = vmatprep.mubr.f32.mxu0 %v3372_v11 }
  0xc1   : > { %2396 = vmatmul.mubr.f32.gmra.mxu0 %v3377_v14 }
  0xc2   : > { %2398 = vmatprep.mubr.f32.mxu0 %v3381_v16 }
  0xc5   : > { %2399 = vmatmul.mubr.f32.gmra.mxu0 %v3231_v50 }
 0x149   : > { %v2355_v47 = vpop.f32.mrf.mxu0 }
 0x14a   : > { %v958_v48 = vadd.f32 %v2355_v47, %v3389_v43 }
 0x14b   : > { %v952_v49 = vpop.f32.mrf.mxu0 }
 0x14c   : > { %v2152_v54 = vmul.f32 -1.442695, %v958_v48  ;;  %v953_v56 = vadd.f32 %v3389_v43, %v952_v49 }
 0x14d   : > { %v2358_v58 = vpop.f32.mrf.mxu0 }
 0x14e   : > { %2548 = vpow2.f32 %v2152_v54  ;;  %v2151_v60 = vmul.f32 -1.442695, %v953_v56  ;;  %v968_v62 = vadd.f32 %v2358_v58, %v3389_v43 }
 0x14f   : > { %v962_v2 = vpop.f32.mrf.mxu0 }
 0x150   : > { %2550 = vpow2.f32 %v2151_v60  ;;  %v2154_v3 = vmul.f32 -1.442695, %v968_v62  ;;  %v963_v4 = vadd.f32 %v3389_v43, %v962_v2 }
 0x151   : > { %v2361_v9 = vpop.f32.mrf.mxu0 }
 0x152   : > { %2552 = vpow2.f32 %v2154_v3  ;;  %v2153_v12 = vmul.f32 -1.442695, %v963_v4  ;;  %v978_v17 = vadd.f32 %v2361_v9, %v3389_v43 }
 0x153   : > { %v972_v20 = vpop.f32.mrf.mxu0 }
 0x154   : > { %2554 = vpow2.f32 %v2153_v12  ;;  %v2156_v18 = vmul.f32 -1.442695, %v978_v17  ;;  %v973_v21 = vadd.f32 %v3389_v43, %v972_v20 }
 0x155   : > { %v2364_v29 = vpop.f32.mrf.mxu0 }
 0x156   : > { %2556 = vpow2.f32 %v2156_v18  ;;  %v2155_v23 = vmul.f32 -1.442695, %v973_v21  ;;  %v988_v24 = vadd.f32 %v2364_v29, %v3389_v43 }
 0x157   : > { %v982_v25 = vpop.f32.mrf.mxu0 }
 0x158   : > { %2558 = vpow2.f32 %v2155_v23  ;;  %v2158_v27 = vmul.f32 -1.442695, %v988_v24  ;;  %v983_v30 = vadd.f32 %v3389_v43, %v982_v25 }
 0x159   : > { %v2367_v31 = vpop.f32.mrf.mxu0 }
 0x15a   : > { %2560 = vpow2.f32 %v2158_v27  ;;  %v2157_v32 = vmul.f32 -1.442695, %v983_v30  ;;  %v998_v35 = vadd.f32 %v2367_v31, %v3389_v43 }
 0x15b   : > { %v2549_v38 = vpop.eup %2548  ;;  %v992_v40 = vpop.f32.mrf.mxu0 }
 0x15c   : > { %v1208_v41 = vadd.f32 1.0, %v2549_v38  ;;  %2562 = vpow2.f32 %v2157_v32  ;;  %v2160_v47 = vmul.f32 -1.442695, %v998_v35  ;;  %v993_v48 = vadd.f32 %v3389_v43, %v992_v40 }
 0x15d   : > { %v2551_v49 = vpop.eup %2550  ;;  %v2370_v54 = vpop.f32.mrf.mxu0 }
 0x15e   : > { %2564 = vrcp.f32 %v1208_v41  ;;  %v2159_v56 = vmul.f32 -1.442695, %v993_v48  ;;  %v1008_v58 = vadd.f32 %v2370_v54, %v3389_v43  ;;  %v1207_v60 = vadd.f32 1.0, %v2551_v49 }
 0x15f   : > { %v2553_v62 = vpop.eup %2552  ;;  %2566 = vpow2.f32 %v2160_v47  ;;  %v1002_v2 = vpop.f32.mrf.mxu0 }
 0x160   : > { %v1210_v3 = vadd.f32 1.0, %v2553_v62  ;;  %2568 = vpow2.f32 %v2159_v56  ;;  %v2162_v4 = vmul.f32 -1.442695, %v1008_v58  ;;  %v1003_v9 = vadd.f32 %v3389_v43, %v1002_v2 }
 0x161   : > { %v2555_v12 = vpop.eup %2554  ;;  %v2373_v17 = vpop.f32.mrf.mxu0  ;;  %2570 = vrcp.f32 %v1207_v60 }
 0x162   : > { %2572 = vrcp.f32 %v1210_v3  ;;  %v1209_v20 = vadd.f32 1.0, %v2555_v12  ;;  %v2161_v18 = vmul.f32 -1.442695, %v1003_v9  ;;  %v1018_v21 = vadd.f32 %v2373_v17, %v3389_v43 }
 0x163   : > { %v2557_v29 = vpop.eup %2556  ;;  %2574 = vpow2.f32 %v2162_v4  ;;  %v1012_v23 = vpop.f32.mrf.mxu0 }
 0x164   : > { %2576 = vrcp.f32 %v1209_v20  ;;  %v1212_v24 = vadd.f32 1.0, %v2557_v29  ;;  %v2164_v25 = vmul.f32 -1.442695, %v1018_v21  ;;  %v1013_v27 = vadd.f32 %v3389_v43, %v1012_v23 }
 0x165   : > { %v2559_v30 = vpop.eup %2558  ;;  %2578 = vpow2.f32 %v2161_v18  ;;  %v2376_v31 = vpop.f32.mrf.mxu0 }
 0x166   : > { %2580 = vrcp.f32 %v1212_v24  ;;  %v1211_v32 = vadd.f32 1.0, %v2559_v30  ;;  %v2163_v35 = vmul.f32 -1.442695, %v1013_v27  ;;  %v1028_v38 = vadd.f32 %v2376_v31, %v3389_v43 }
 0x167   : > { %v2561_v40 = vpop.eup %2560  ;;  %2582 = vpow2.f32 %v2164_v25  ;;  %v1022_v41 = vpop.f32.mrf.mxu0 }
 0x168   : > { %2584 = vrcp.f32 %v1211_v32  ;;  %v1214_v47 = vadd.f32 1.0, %v2561_v40  ;;  %v2166_v48 = vmul.f32 -1.442695, %v1028_v38  ;;  %v1023_v49 = vadd.f32 %v3389_v43, %v1022_v41 }
 0x169   : > { %v2563_v54 = vpop.eup %2562  ;;  %2586 = vpow2.f32 %v2163_v35  ;;  %v2379_v56 = vpop.f32.mrf.mxu0 }
 0x16a   : > { %2588 = vrcp.f32 %v1214_v47  ;;  %v1213_v58 = vadd.f32 1.0, %v2563_v54  ;;  %v2165_v60 = vmul.f32 -1.442695, %v1023_v49  ;;  %v1038_v62 = vadd.f32 %v2379_v56, %v3389_v43 }
 0x16b   : > { %v2565_v2 = vpop.eup %2564  ;;  %2590 = vpow2.f32 %v2166_v48  ;;  %v1032_v3 = vpop.f32.mrf.mxu0 }
 0x16c   : > { %v2567_v4 = vpop.eup %2566  ;;  %2592 = vrcp.f32 %v1213_v58  ;;  %v2168_v9 = vmul.f32 -1.442695, %v1038_v62  ;;  %v1033_v12 = vadd.f32 %v3389_v43, %v1032_v3 }
 0x16d   : > { %v2569_v17 = vpop.eup %2568  ;;  %v1216_v20 = vadd.f32 1.0, %v2567_v4  ;;  %2594 = vpow2.f32 %v2165_v60  ;;  %v2382_v18 = vpop.f32.mrf.mxu0 }
 0x16e   : > { %v2571_v21 = vpop.eup %2570  ;;  %v1215_v29 = vadd.f32 1.0, %v2569_v17  ;;  %2596 = vpow2.f32 %v2168_v9  ;;  %v2167_v23 = vmul.f32 -1.442695, %v1033_v12  ;;  %v1048_v24 = vadd.f32 %v2382_v18, %v3389_v43 }
 0x16f   : > { %v2573_v25 = vpop.eup %2572  ;;  %2598 = vrcp.f32 %v1216_v20  ;;  %2433 = vmatprep.mubr.f32.mxu1 %v2571_v21  ;;  %v1042_v27 = vpop.f32.mrf.mxu0 }
 0x170   : > { %v2575_v30 = vpop.eup %2574  ;;  %2600 = vrcp.f32 %v1215_v29  ;;  %v2170_v31 = vmul.f32 -1.442695, %v1048_v24  ;;  %v1043_v32 = vadd.f32 %v3389_v43, %v1042_v27  ;;  %2434 = vmatmul.mubr.f32.vlgmr.msra.gmra.mxu1 %v2565_v2 }
 0x171   : > { %v2577_v35 = vpop.eup %2576  ;;  %v1218_v38 = vadd.f32 1.0, %v2575_v30  ;;  %2602 = vpow2.f32 %v2167_v23  ;;  %v2385_v40 = vpop.f32.mrf.mxu0 }
 0x172   : > { %v2579_v41 = vpop.eup %2578  ;;  %2604 = vpow2.f32 %v2170_v31  ;;  %v2169_v47 = vmul.f32 -1.442695, %v1043_v32  ;;  %v1058_v48 = vadd.f32 %v2385_v40, %v3389_v43  ;;  %2436 = vmatprep.mubr.f32.mxu1 %v2577_v35 }
 0x173   : > { %v2581_v49 = vpop.eup %2580  ;;  %2606 = vrcp.f32 %v1218_v38  ;;  %v1217_v54 = vadd.f32 1.0, %v2579_v41  ;;  %v1052_v56 = vpop.f32.mrf.mxu0 }
 0x174   : > { %v2583_v58 = vpop.eup %2582  ;;  %2608 = vpow2.f32 %v2169_v47  ;;  %v2172_v60 = vmul.f32 -1.442695, %v1058_v48  ;;  %v1053_v62 = vadd.f32 %v3389_v43, %v1052_v56  ;;  %2437 = vmatmul.mubr.f32.gmra.mxu1 %v2573_v25 }
 0x175   : > { %v2585_v2 = vpop.eup %2584  ;;  %2610 = vrcp.f32 %v1217_v54  ;;  %v1220_v3 = vadd.f32 1.0, %v2583_v58  ;;  %v2388_v4 = vpop.f32.mrf.mxu0 }
 0x176   : > { %v2587_v9 = vpop.eup %2586  ;;  %2612 = vpow2.f32 %v2172_v60  ;;  %v2171_v12 = vmul.f32 -1.442695, %v1053_v62  ;;  %v1068_v17 = vadd.f32 %v2388_v4, %v3389_v43  ;;  %2439 = vmatprep.mubr.f32.mxu1 %v2585_v2 }
 0x177   : > { %v2589_v20 = vpop.eup %2588  ;;  %2614 = vrcp.f32 %v1220_v3  ;;  %v1219_v18 = vadd.f32 1.0, %v2587_v9  ;;  %v1062_v21 = vpop.f32.mrf.mxu0 }
 0x178   : > { %v2591_v29 = vpop.eup %2590  ;;  %2616 = vpow2.f32 %v2171_v12  ;;  %v2174_v23 = vmul.f32 -1.442695, %v1068_v17  ;;  %v1063_v24 = vadd.f32 %v3389_v43, %v1062_v21  ;;  %2440 = vmatmul.mubr.f32.gmra.mxu1 %v2581_v49 }
 0x179   : > { %v2593_v25 = vpop.eup %2592  ;;  %2618 = vrcp.f32 %v1219_v18  ;;  %v1222_v27 = vadd.f32 1.0, %v2591_v29  ;;  %v2391_v30 = vpop.f32.mrf.mxu0 }
 0x17a   : > { %v2595_v31 = vpop.eup %2594  ;;  %2620 = vpow2.f32 %v2174_v23  ;;  %v2173_v32 = vmul.f32 -1.442695, %v1063_v24  ;;  %v1078_v35 = vadd.f32 %v2391_v30, %v3389_v43  ;;  %2442 = vmatprep.mubr.f32.mxu1 %v2593_v25 }
 0x17b   : > { %v2597_v38 = vpop.eup %2596  ;;  %2622 = vrcp.f32 %v1222_v27  ;;  %v1221_v40 = vadd.f32 1.0, %v2595_v31  ;;  %v1072_v41 = vpop.f32.mrf.mxu0 }
 0x17c   : > { %v2599_v47 = vpop.eup %2598  ;;  %v1224_v48 = vadd.f32 1.0, %v2597_v38  ;;  %2624 = vpow2.f32 %v2173_v32  ;;  %v2176_v54 = vmul.f32 -1.442695, %v1078_v35  ;;  %v1073_v49 = vadd.f32 %v3389_v43, %v1072_v41  ;;  %2443 = vmatmul.mubr.f32.gmra.mxu1 %v2589_v20 }
 0x17d   : > { %v2601_v56 = vpop.eup %2600  ;;  %2626 = vrcp.f32 %v1221_v40  ;;  %v2394_v58 = vpop.f32.mrf.mxu0 }
 0x17e   : > { %v2603_v60 = vpop.eup %2602  ;;  %2628 = vrcp.f32 %v1224_v48  ;;  %v2175_v62 = vmul.f32 -1.442695, %v1073_v49  ;;  %v1088_v2 = vadd.f32 %v2394_v58, %v3389_v43  ;;  %2445 = vmatprep.mubr.f32.mxu1 %v2601_v56 }
 0x17f   : > { %v2605_v3 = vpop.eup %2604  ;;  %v1223_v4 = vadd.f32 1.0, %v2603_v60  ;;  %2630 = vpow2.f32 %v2176_v54  ;;  %v1082_v9 = vpop.f32.mrf.mxu0 }
 0x180   : > { %v2607_v12 = vpop.eup %2606  ;;  %v1226_v17 = vadd.f32 1.0, %v2605_v3  ;;  %2632 = vpow2.f32 %v2175_v62  ;;  %v2178_v18 = vmul.f32 -1.442695, %v1088_v2  ;;  %v1083_v21 = vadd.f32 %v3389_v43, %v1082_v9  ;;  %2446 = vmatmul.mubr.f32.gmra.mxu1 %v2599_v47 }
 0x181   : > { %v2609_v20 = vpop.eup %2608  ;;  %2634 = vrcp.f32 %v1223_v4  ;;  %v2397_v29 = vpop.f32.mrf.mxu0 }
 0x182   : > { %v2611_v23 = vpop.eup %2610  ;;  %2636 = vrcp.f32 %v1226_v17  ;;  %v1225_v24 = vadd.f32 1.0, %v2609_v20  ;;  %v2177_v25 = vmul.f32 -1.442695, %v1083_v21  ;;  %v1098_v27 = vadd.f32 %v2397_v29, %v3389_v43 }
 0x183   : > { %v2613_v30 = vpop.eup %2612  ;;  %2638 = vpow2.f32 %v2178_v18  ;;  %2448 = vmatprep.mubr.f32.mxu1 %v2611_v23  ;;  %v1092_v31 = vpop.f32.mrf.mxu0 }
 0x184   : > { %v2615_v32 = vpop.eup %2614  ;;  %2640 = vrcp.f32 %v1225_v24  ;;  %v2180_v35 = vmul.f32 -1.442695, %v1098_v27  ;;  %v1093_v38 = vadd.f32 %v3389_v43, %v1092_v31  ;;  %2449 = vmatmul.mubr.f32.gmra.mxu1 %v2607_v12  ;;  %v1228_v48 = vadd.f32 1.0, %v2613_v30 }
 0x185   : > { %v2617_v40 = vpop.eup %2616  ;;  %2642 = vpow2.f32 %v2177_v25  ;;  %v2400_v41 = vpop.f32.mrf.mxu0 }
 0x186   : > { %v2619_v47 = vpop.eup %2618  ;;  %v1227_v54 = vadd.f32 1.0, %v2617_v40  ;;  %v2179_v49 = vmul.f32 -1.442695, %v1093_v38  ;;  %v1108_v56 = vadd.f32 %v2400_v41, %v3389_v43  ;;  %2644 = vpow2.f32 %v2180_v35 }
 0x187   : > { %v2621_v58 = vpop.eup %2620  ;;  %2451 = vmatprep.mubr.f32.mxu1 %v2619_v47  ;;  %v1102_v60 = vpop.f32.mrf.mxu0 }
 0x188   : > { %v2623_v62 = vpop.eup %2622  ;;  %2646 = vrcp.f32 %v1227_v54  ;;  %v2182_v2 = vmul.f32 -1.442695, %v1108_v56  ;;  %v1103_v3 = vadd.f32 %v3389_v43, %v1102_v60  ;;  %2452 = vmatmul.mubr.f32.gmra.mxu1 %v2615_v32  ;;  %v1230_v12 = vadd.f32 1.0, %v2621_v58 }
 0x189   : > { %v2625_v4 = vpop.eup %2624  ;;  %2648 = vpow2.f32 %v2179_v49 }
 0x18a   : > { %v2627_v9 = vpop.eup %2626  ;;  %2650 = vrcp.f32 %v1228_v48  ;;  %v1229_v17 = vadd.f32 1.0, %v2625_v4  ;;  %v2181_v18 = vmul.f32 -1.442695, %v1103_v3 }
 0x18b   : > { %v2629_v21 = vpop.eup %2628  ;;  %2652 = vpow2.f32 %v2182_v2  ;;  %2454 = vmatprep.mubr.f32.mxu1 %v2627_v9 }
 0x18c   : > { %v2631_v20 = vpop.eup %2630  ;;  %2654 = vrcp.f32 %v1229_v17  ;;  %2455 = vmatmul.mubr.f32.gmra.mxu1 %v2623_v62 }
 0x18d   : > { %v2633_v29 = vpop.eup %2632  ;;  %2656 = vpow2.f32 %v2181_v18  ;;  %v1232_v24 = vadd.f32 1.0, %v2631_v20 }
 0x18e   : > { %v2635_v23 = vpop.eup %2634  ;;  %2658 = vrcp.f32 %v1230_v12  ;;  %v1231_v43 = vadd.f32 1.0, %v2633_v29  ;;  %v3426_v29 = vld [vmem:[%s3806_s6] ss:$0 sm:$0xff] }
 0x18f   : > { %v2637_v25 = vpop.eup %2636  ;;  %2457 = vmatprep.mubr.f32.mxu1 %v2635_v23 }
 0x190   : > { %v2639_v27 = vpop.eup %2638  ;;  %2660 = vrcp.f32 %v1231_v43  ;;  %2458 = vmatmul.mubr.f32.gmra.mxu1 %v2629_v21  ;;  %v702_v43 = vadd.s32 8, %v3177_v5 }
 0x191   : > { %v2641_v30 = vpop.eup %2640  ;;  %2662 = vrcp.f32 %v1232_v24  ;;  %v1234_v32 = vadd.f32 1.0, %v2639_v27  ;;  %v3431_v27 = vstv %s2117_s27  ;;  %s3892_s27 = sld [smem:[#allocation28_spill]] (!%p2217_p13) }
 0x192   : > { %v2643_v31 = vpop.eup %2642  ;;  %2460 = vmatprep.mubr.f32.mxu1 %v2641_v30 }
 0x193   : > { %v1233_v35 = vadd.f32 1.0, %v2643_v31  ;;  %v2645_v38 = vpop.eup %2644 }
 0x194   : > { %2461 = vmatmul.mubr.f32.gmra.mxu1 %v2637_v25  ;;  %v1236_v47 = vadd.f32 1.0, %v2645_v38  ;;  %v703_v38 = vadd.s32 16, %v3177_v5 }
 0x195   : > { %v2647_v40 = vpop.eup %2646  ;;  %2664 = vrcp.f32 %v1233_v35 }
 0x196   : > { %v2649_v41 = vpop.eup %2648  ;;  %2666 = vrcp.f32 %v1234_v32  ;;  %2463 = vmatprep.mubr.f32.mxu1 %v2647_v40  ;;  %v704_v32 = vadd.s32 24, %v3177_v5 }
 0x197   : > { %v2651_v48 = vpop.eup %2650  ;;  %v1235_v54 = vadd.f32 1.0, %v2649_v41  ;;  %s3893_s15 = smov (!%p2217_p13), %s3892_s27 }
 0x198   : > { %v2653_v49 = vpop.eup %2652  ;;  %2464 = vmatmul.mubr.f32.gmra.mxu1 %v2651_v48 }
 0x199   : > { %v2655_v56 = vpop.eup %2654  ;;  %2668 = vrcp.f32 %v1235_v54  ;;  %v1238_v60 = vadd.f32 1.0, %v2653_v49  ;;  %v706_v54 = vadd.s32 40, %v3177_v5 }
 0x19a   : > { %v2657_v58 = vpop.eup %2656  ;;  %2670 = vrcp.f32 %v1236_v47  ;;  %2466 = vmatprep.mubr.f32.mxu1 %v2655_v56  ;;  %v736_v47 = vadd.s32 %v3431_v27, %v702_v43 }
 0x19b   : > { %v2659_v62 = vpop.eup %2658  ;;  %v1237_v2 = vadd.f32 1.0, %v2657_v58  ;;  %v705_v58 = vadd.s32 32, %v3177_v5 }
 0x19c   : > { %2467 = vmatmul.mubr.f32.gmra.mxu1 %v2659_v62  ;;  %v738_v62 = vadd.s32 %v3431_v27, %v704_v32  ;;  %vm768_vm0 = vcmp.lt.s32.totalorder %v736_v47, 500 }
 0x19d   : > { %v2661_v3 = vpop.eup %2660  ;;  %2672 = vrcp.f32 %v1237_v2  ;;  %v737_v2 = vadd.s32 %v3431_v27, %v703_v38  ;;  %v3827_v38 = vmov 0.0  }
 0x19e   : > { %2674 = vrcp.f32 %v1238_v60  ;;  %2469 = vmatprep.mubr.f32.mxu1 %v2661_v3  ;;  %v2663_v4 = vpop.eup %2662  ;;  %v735_v60 = vadd.s32 %v3431_v27, %v3177_v5  ;;  %vm770_vm2 = vcmp.lt.s32.totalorder %v738_v62, 500 }
 0x19f   : > { %vm769_vm3 = vcmp.lt.s32.totalorder %v737_v2, 500  ;;  %v3468_v47 = vsel %vm770_vm2, 1.0, %v3827_v38 }
 0x1a0   : > { %2470 = vmatmul.mubr.f32.gmra.mxu1 %v2663_v4  ;;  %v708_v4 = vadd.s32 56, %v3177_v5  ;;  %vm767_vm1 = vcmp.lt.s32.totalorder %v735_v60, 500 }
 0x1a2   : > { %v2665_v9 = vpop.eup %2664 }
 0x1a3   : > { %v2667_v12 = vpop.eup %2666  ;;  %2472 = vmatprep.mubr.f32.mxu1 %v2665_v9 }
 0x1a4   : > { %2473 = vmatmul.mubr.f32.gmra.mxu1 %v2667_v12 }
 0x1a6   : > { %v2669_v17 = vpop.eup %2668 }
 0x1a7   : > { %v2671_v18 = vpop.eup %2670  ;;  %2475 = vmatprep.mubr.f32.mxu1 %v2669_v17  ;;  %v707_v17 = vadd.s32 48, %v3177_v5 }
 0x1a8   : > { %2476 = vmatmul.mubr.f32.gmra.mxu1 %v2671_v18  ;;  %v740_v18 = vadd.s32 %v3431_v27, %v706_v54  ;;  %v709_v54 = vadd.s32 64, %v3177_v5 }
 0x1aa   : > { %v2673_v21 = vpop.eup %2672  ;;  %vm772_vm4 = vcmp.lt.s32.totalorder %v740_v18, 500  ;;  %v743_v2 = vadd.s32 %v3431_v27, %v709_v54 }
 0x1ab   : > { %v2675_v20 = vpop.eup %2674  ;;  %2478 = vmatprep.mubr.f32.mxu1 %v2673_v21  ;;  %v3477_v60 = vsel %vm772_vm4, 1.0, %v3827_v38 }
 0x1ac   : > { %2479 = vmatmul.mubr.f32.gmra.mxu1 %v2675_v20  ;;  %v710_v20 = vadd.s32 72, %v3177_v5  ;;  %vm775_vm9 = vcmp.lt.s32.totalorder %v743_v2, 500 }
 0x230   : > { %v2435_v23 = vpop.f32.mrf.mxu1 }
 0x231   : > { %v1398_v24 = vadd.f32 %v2435_v23, %v3426_v29 }
 0x232   : > { %v1392_v25 = vpop.f32.mrf.mxu1 }
 0x233   : > { %v2185_v30 = vmul.f32 -1.442695, %v1398_v24  ;;  %v1393_v31 = vadd.f32 %v3426_v29, %v1392_v25  ;;  %v739_v24 = vadd.s32 %v3431_v27, %v705_v58  ;;  %v742_v25 = vadd.s32 %v3431_v27, %v708_v4 }
 0x234   : > { %v2438_v35 = vpop.f32.mrf.mxu1  ;;  %v3464_v58 = vsel %vm767_vm1, 1.0, %v3827_v38 }
 0x235   : > { %2676 = vpow2.f32 %v2185_v30  ;;  %v2184_v40 = vmul.f32 -1.442695, %v1393_v31  ;;  %v1408_v41 = vadd.f32 %v2438_v35, %v3426_v29  ;;  %v741_v35 = vadd.s32 %v3431_v27, %v707_v17 }
 0x236   : > { %v1402_v48 = vpop.f32.mrf.mxu1  ;;  %vm771_vm5 = vcmp.lt.s32.totalorder %v739_v24, 500  ;;  %vm774_vm6 = vcmp.lt.s32.totalorder %v742_v25, 500 }
 0x237   : > { %2678 = vpow2.f32 %v2184_v40  ;;  %v2187_v49 = vmul.f32 -1.442695, %v1408_v41  ;;  %v1403_v56 = vadd.f32 %v3426_v29, %v1402_v48  ;;  %v3457_v40 = vsel %vm768_vm0, 1.0, %v3827_v38 }
 0x238   : > { %v2441_v3 = vpop.f32.mrf.mxu1  ;;  %v744_v48 = vadd.s32 %v3431_v27, %v710_v20  ;;  %vm773_vm7 = vcmp.lt.s32.totalorder %v741_v35, 500  ;;  %v3480_v62 = vsel %vm771_vm5, 1.0, %v3827_v38  ;;  %v711_v35 = vadd.s32 80, %v3177_v5 }
 0x239   : > { %2680 = vpow2.f32 %v2187_v49  ;;  %v2186_v9 = vmul.f32 -1.442695, %v1403_v56  ;;  %v1418_v12 = vadd.f32 %v2441_v3, %v3426_v29  ;;  %v3472_v3 = vsel %vm769_vm3, 1.0, %v3827_v38 }
 0x23a   : > { %v1412_v21 = vpop.f32.mrf.mxu1  ;;  %vm776_vm8 = vcmp.lt.s32.totalorder %v744_v48, 500  ;;  %v3489_v18 = vsel %vm773_vm7, 1.0, %v3827_v38  ;;  %v713_v48 = vadd.s32 96, %v3177_v5 }
 0x23b   : > { %2682 = vpow2.f32 %v2186_v9  ;;  %v2189_v23 = vmul.f32 -1.442695, %v1418_v12  ;;  %v1413_v43 = vadd.f32 %v3426_v29, %v1412_v21 }
 0x23c   : > { %v2444_v30 = vpop.f32.mrf.mxu1 }
 0x23d   : > { %2684 = vpow2.f32 %v2189_v23  ;;  %v2188_v31 = vmul.f32 -1.442695, %v1413_v43  ;;  %v1428_v32 = vadd.f32 %v2444_v30, %v3426_v29  ;;  %v3486_v30 = vsel %vm774_vm6, 1.0, %v3827_v38 }
 0x23e   : > { %v1422_v41 = vpop.f32.mrf.mxu1 }
 0x23f   : > { %2686 = vpow2.f32 %v2188_v31  ;;  %v2191_v49 = vmul.f32 -1.442695, %v1428_v32  ;;  %v1423_v56 = vadd.f32 %v3426_v29, %v1422_v41  ;;  %v712_v31 = vadd.s32 88, %v3177_v5 }
 0x240   : > { %v2447_v4 = vpop.f32.mrf.mxu1 }
 0x241   : > { %2688 = vpow2.f32 %v2191_v49  ;;  %v2190_v9 = vmul.f32 -1.442695, %v1423_v56  ;;  %v1438_v12 = vadd.f32 %v2447_v4, %v3426_v29  ;;  %v3496_v4 = vsel %vm776_vm8, 1.0, %v3827_v38 }
 0x242   : > { %v2677_v17 = vpop.eup %2676  ;;  %v1432_v21 = vpop.f32.mrf.mxu1 }
 0x243   : > { %v1648_v20 = vadd.f32 1.0, %v2677_v17  ;;  %2690 = vpow2.f32 %v2190_v9  ;;  %v2193_v23 = vmul.f32 -1.442695, %v1438_v12  ;;  %v1433_v24 = vadd.f32 %v3426_v29, %v1432_v21 }
 0x244   : > { %v2679_v43 = vpop.eup %2678  ;;  %v2450_v32 = vpop.f32.mrf.mxu1  ;;  %v714_v9 = vadd.s32 104, %v3177_v5 }
 0x245   : > { %2692 = vrcp.f32 %v1648_v20  ;;  %v1647_v41 = vadd.f32 1.0, %v2679_v43  ;;  %v2192_v54 = vmul.f32 -1.442695, %v1433_v24  ;;  %v1448_v49 = vadd.f32 %v2450_v32, %v3426_v29 }
 0x246   : > { %v2681_v56 = vpop.eup %2680  ;;  %2694 = vpow2.f32 %v2193_v23  ;;  %v1442_v25 = vpop.f32.mrf.mxu1  ;;  %v746_v24 = vadd.s32 %v3431_v27, %v712_v31  ;;  %v745_v43 = vadd.s32 %v3431_v27, %v711_v35  ;;  %v716_v31 = vadd.s32 120, %v3177_v5 }
 0x247   : > { %2696 = vrcp.f32 %v1647_v41  ;;  %v1650_v12 = vadd.f32 1.0, %v2681_v56  ;;  %v2195_v17 = vmul.f32 -1.442695, %v1448_v49  ;;  %v1443_v21 = vadd.f32 %v3426_v29, %v1442_v25 }
 0x248   : > { %v2683_v20 = vpop.eup %2682  ;;  %2698 = vpow2.f32 %v2192_v54  ;;  %v2453_v32 = vpop.f32.mrf.mxu1  ;;  %v3878_v41 = vmov 0.0   ;;  %v748_v54 = vadd.s32 %v3431_v27, %v714_v9  ;;  %vm778_vm10 = vcmp.lt.s32.totalorder %v746_v24, 500 }
 0x249   : > { %2700 = vrcp.f32 %v1650_v12  ;;  %v1649_v23 = vadd.f32 1.0, %v2683_v20  ;;  %v2194_v38 = vmul.f32 -1.442695, %v1443_v21  ;;  %v1458_v10 = vadd.f32 %v2453_v32, %v3426_v29 }
 0x24a   : > { %v2685_v16 = vpop.eup %2684  ;;  %v3506_v49 = vsel %vm775_vm9, 1.0, %v3878_v41  ;;  %2702 = vpow2.f32 %v2195_v17  ;;  %v1452_v56 = vpop.f32.mrf.mxu1  ;;  %vm777_vm11 = vcmp.lt.s32.totalorder %v745_v43, 500  ;;  %v747_v21 = vadd.s32 %v3431_v27, %v713_v48 }
 0x24b   : > { %2704 = vrcp.f32 %v1649_v23  ;;  %v1652_v35 = vadd.f32 1.0, %v2685_v16  ;;  %v2197_v25 = vmul.f32 -1.442695, %v1458_v10  ;;  %v1453_v12 = vadd.f32 %v3426_v29, %v1452_v56 }
 0x24c   : > { %v2687_v20 = vpop.eup %2686  ;;  %2706 = vpow2.f32 %v2194_v38  ;;  %v2456_v2 = vpop.f32.mrf.mxu1  ;;  %vm780_vm12 = vcmp.lt.s32.totalorder %v748_v54, 500  ;;  %v750_v16 = vadd.s32 %v3431_v27, %v716_v31  ;;  %v715_v10 = vadd.s32 112, %v3177_v5 }
 0x24d   : > { %2708 = vrcp.f32 %v1652_v35  ;;  %v1651_v32 = vadd.f32 1.0, %v2687_v20  ;;  %v2196_v17 = vmul.f32 -1.442695, %v1453_v12  ;;  %v1468_v9 = vadd.f32 %v2456_v2, %v3426_v29 }
 0x24e   : > { %v2689_v50 = vpop.eup %2688  ;;  %2710 = vpow2.f32 %v2197_v25  ;;  %v1462_v23 = vpop.f32.mrf.mxu1  ;;  %v3518_v35 = vsel %vm778_vm10, 1.0, %v3878_v41  ;;  %v3522_v12 = vsel %vm777_vm11, 1.0, %v3878_v41  ;;  %vm779_vm13 = vcmp.lt.s32.totalorder %v747_v21, 500 }
 0x24f   : > { %2712 = vrcp.f32 %v1651_v32  ;;  %v1654_v56 = vadd.f32 1.0, %v2689_v50  ;;  %v2199_v11 = vmul.f32 -1.442695, %v1468_v9  ;;  %v1463_v38 = vadd.f32 %v3426_v29, %v1462_v23 }
 0x250   : > { %v2691_v48 = vpop.eup %2690  ;;  %2714 = vpow2.f32 %v2196_v17  ;;  %v2459_v31 = vpop.f32.mrf.mxu1  ;;  %v3527_v32 = vsel %vm780_vm12, 1.0, %v3878_v41  ;;  %vm782_vm14 = vcmp.lt.s32.totalorder %v750_v16, 500  ;;  %v749_v24 = vadd.s32 %v3431_v27, %v715_v10 }
 0x251   : > { %2716 = vrcp.f32 %v1654_v56  ;;  %v1653_v25 = vadd.f32 1.0, %v2691_v48  ;;  %v2198_v20 = vmul.f32 -1.442695, %v1463_v38  ;;  %v1478_v50 = vadd.f32 %v2459_v31, %v3426_v29 }
 0x252   : > { %v2693_v2 = vpop.eup %2692  ;;  %2718 = vpow2.f32 %v2199_v11  ;;  %v1472_v43 = vpop.f32.mrf.mxu1  ;;  %v3534_v31 = vsel %vm779_vm13, 1.0, %v3878_v41  ;;  %v718_v54 = vadd.s32 136, %v3177_v5  ;;  %vm781_vm15 = vcmp.lt.s32.totalorder %v749_v24, 500 }
 0x253   : > { %v2695_v9 = vpop.eup %2694  ;;  %v1744_v23 = vsub.f32 %v2693_v2, %v3208_v37  ;;  %2720 = vrcp.f32 %v1653_v25  ;;  %v2201_v17 = vmul.f32 -1.442695, %v1478_v50  ;;  %v1473_v56 = vadd.f32 %v3426_v29, %v1472_v43  ;;  %v3540_v37 = vld [vmem:[%s3807_s7] ss:$0 sm:$0xff] }
 0x254   : > { %v2697_v38 = vpop.eup %2696  ;;  %v1656_v48 = vadd.f32 1.0, %v2695_v9  ;;  %2722 = vpow2.f32 %v2198_v20  ;;  %v2462_v11 = vpop.f32.mrf.mxu1  ;;  %v3545_v20 = vsel %vm782_vm14, 1.0, %v3878_v41 }
 0x255   : > { %v2699_v14 = vpop.eup %2698  ;;  %v1776_v10 = vmul.f32 %v1744_v23, %v1744_v23  ;;  %v1743_v25 = vsub.f32 %v2697_v38, %v3202_v33  ;;  %2724 = vpow2.f32 %v2201_v17  ;;  %v2200_v50 = vmul.f32 -1.442695, %v1473_v56 }
 0x256   : > { %v2701_v2 = vpop.eup %2700  ;;  %2726 = vrcp.f32 %v1656_v48  ;;  %v1655_v21 = vadd.f32 1.0, %v2699_v14  ;;  %v1482_v43 = vpop.f32.mrf.mxu1  ;;  %v1488_v7 = vadd.f32 %v2462_v11, %v3426_v29  ;;  %v3551_v14 = vadd.s32 %v3431_v27, %v718_v54 }
 0x257   : > { %v2703_v9 = vpop.eup %2702  ;;  %v1775_v23 = vmul.f32 %v1743_v25, %v1743_v25  ;;  %v1746_v0 = vsub.f32 %v2701_v2, %v3220_v44  ;;  %2728 = vpow2.f32 %v2200_v50  ;;  %v1815_v33 = vmul.f32 %v3540_v37, %v1776_v10 }
 0x258   : > { %v2705_v55 = vpop.eup %2704  ;;  %2730 = vrcp.f32 %v1655_v21  ;;  %v1658_v17 = vadd.f32 1.0, %v2703_v9  ;;  %v2465_v16 = vpop.f32.mrf.mxu1  ;;  %v1483_v44 = vadd.f32 %v3426_v29, %v1482_v43  ;;  %v3557_v2 = vadd.s32 128, %v3177_v5 }
 0x259   : > { %v2707_v56 = vpop.eup %2706  ;;  %v1814_v38 = vmul.f32 %v3540_v37, %v1775_v23  ;;  %v1778_v48 = vmul.f32 %v1746_v0, %v1746_v0  ;;  %v1745_v25 = vsub.f32 %v2705_v55, %v3212_v39  ;;  %v1498_v10 = vadd.f32 %v2465_v16, %v3426_v29 }
 0x25a   : > { %v2709_v50 = vpop.eup %2708  ;;  %2732 = vrcp.f32 %v1658_v17  ;;  %v1657_v11 = vadd.f32 1.0, %v2707_v56  ;;  %v1492_v21 = vpop.f32.mrf.mxu1  ;;  %v2203_v0 = vmul.f32 -1.442695, %v1488_v7  ;;  %v1847_v39 = vmul.f32 %v3457_v40, %v1815_v33 }
 0x25b   : > { %v2711_v54 = vpop.eup %2710  ;;  %v1846_v9 = vmul.f32 %v3464_v58, %v1814_v38  ;;  %v1777_v61 = vmul.f32 %v1745_v25, %v1745_v25  ;;  %v1748_v23 = vsub.f32 %v2709_v50, %v3235_v51  ;;  %v3565_v43 = vsel %vm781_vm15, 1.0, %v3878_v41 }
 0x25c   : > { %v2713_v45 = vpop.eup %2712  ;;  %2734 = vrcp.f32 %v1657_v11  ;;  %v1660_v55 = vadd.f32 1.0, %v2711_v54  ;;  %v2468_v17 = vpop.f32.mrf.mxu1  ;;  %v1817_v16 = vmul.f32 %v3540_v37, %v1778_v48  ;;  %v2202_v38 = vmul.f32 -1.442695, %v1483_v44 }
 0x25d   : > { %v2715_v56 = vpop.eup %2714  ;;  %v1816_v52 = vmul.f32 %v3540_v37, %v1777_v61  ;;  %v1780_v58 = vmul.f32 %v1748_v23, %v1748_v23  ;;  %v1747_v51 = vsub.f32 %v2713_v45, %v3225_v46  ;;  %v2205_v40 = vmul.f32 -1.442695, %v1498_v10 }
 0x25e   : > { %v2717_v25 = vpop.eup %2716  ;;  %2736 = vrcp.f32 %v1660_v55  ;;  %v1659_v7 = vadd.f32 1.0, %v2715_v56  ;;  %v1502_v33 = vpop.f32.mrf.mxu1  ;;  %v1879_v11 = vadd.f32 %v1847_v39, %v1846_v9  ;;  %v1849_v46 = vmul.f32 %v3468_v47, %v1817_v16 }
 0x25f   : > { %v2719_v50 = vpop.eup %2718  ;;  %v1848_v24 = vmul.f32 %v3472_v3, %v1816_v52  ;;  %v1750_v54 = vsub.f32 %v2717_v25, %v3247_v57  ;;  %2738 = vpow2.f32 %v2203_v0  ;;  %v1819_v48 = vmul.f32 %v3540_v37, %v1780_v58 }
 0x260   : > { %v2721_v36 = vpop.eup %2720  ;;  %v1779_v61 = vmul.f32 %v1747_v51, %v1747_v51  ;;  %2740 = vrcp.f32 %v1659_v7  ;;  %v1662_v44 = vadd.f32 1.0, %v2719_v50  ;;  %v2471_v23 = vpop.f32.mrf.mxu1  ;;  %v1493_v3 = vadd.f32 %v3426_v29, %v1492_v21 }
 0x261   : > { %v2723_v42 = vpop.eup %2722  ;;  %v1880_v45 = vadd.f32 %v1879_v11, %v1848_v24  ;;  %v1782_v10 = vmul.f32 %v1750_v54, %v1750_v54  ;;  %v1749_v55 = vsub.f32 %v2721_v36, %v3240_v53  ;;  %v1508_v51 = vadd.f32 %v2468_v17, %v3426_v29 }
 0x262   : > { %v2725_v9 = vpop.eup %2724  ;;  %v1818_v52 = vmul.f32 %v3540_v37, %v1779_v61  ;;  %2742 = vrcp.f32 %v1662_v44  ;;  %v1661_v57 = vadd.f32 1.0, %v2723_v42  ;;  %v1512_v0 = vpop.f32.mrf.mxu1  ;;  %v1851_v47 = vmul.f32 %v3477_v60, %v1819_v48 }
 0x263   : > { %v2727_v39 = vpop.eup %2726  ;;  %v1881_v56 = vadd.f32 %v1880_v45, %v1849_v46  ;;  %v1781_v58 = vmul.f32 %v1749_v55, %v1749_v55  ;;  %v1664_v25 = vadd.f32 1.0, %v2725_v9  ;;  %v1821_v42 = vmul.f32 %v3540_v37, %v1782_v10 }
 0x264   : > { %v2729_v7 = vpop.eup %2728  ;;  %v1850_v16 = vmul.f32 %v3480_v62, %v1818_v52  ;;  %v1752_v53 = vsub.f32 %v2727_v39, %v3259_v63  ;;  %2744 = vrcp.f32 %v1661_v57  ;;  %v2474_v36 = vpop.f32.mrf.mxu1  ;;  %v2204_v63 = vmul.f32 -1.442695, %v1493_v3 }
 0x265   : > { %v2731_v50 = vpop.eup %2730  ;;  %v1820_v21 = vmul.f32 %v3540_v37, %v1781_v58  ;;  %2746 = vrcp.f32 %v1664_v25  ;;  %v1663_v11 = vadd.f32 1.0, %v2729_v7  ;;  %v1503_v48 = vadd.f32 %v3426_v29, %v1502_v33 }
 0x266   : > { %v1882_v24 = vadd.f32 %v1881_v56, %v1850_v16  ;;  %v1784_v54 = vmul.f32 %v1752_v53, %v1752_v53  ;;  %v1751_v17 = vsub.f32 %v2731_v50, %v3252_v59  ;;  %2748 = vpow2.f32 %v2202_v38  ;;  %v1522_v61 = vpop.f32.mrf.mxu1 }
 0x267   : > { %v2733_v60 = vpop.eup %2732  ;;  %v1852_v62 = vmul.f32 %v3489_v18, %v1820_v21  ;;  %2750 = vrcp.f32 %v1663_v11  ;;  %v1518_v10 = vadd.f32 %v2471_v23, %v3426_v29  ;;  %v3590_v9 = vadd.s32 %v3431_v27, %v3557_v2 }
 0x268   : > { %v1883_v44 = vadd.f32 %v1882_v24, %v1851_v47  ;;  %v1783_v46 = vmul.f32 %v1751_v17, %v1751_v17  ;;  %v1754_v45 = vsub.f32 %v2733_v60, %v3271_v6  ;;  %v3593_v59 = vadd.s32 152, %v3177_v5  ;;  %v2477_v38 = vpop.f32.mrf.mxu1 }
 0x269   : > { %v2735_v55 = vpop.eup %2734  ;;  %2752 = vpow2.f32 %v2205_v40  ;;  %v2207_v18 = vmul.f32 -1.442695, %v1508_v51  ;;  %v1853_v52 = vmul.f32 %v3486_v30, %v1821_v42  ;;  %v1823_v57 = vmul.f32 %v3540_v37, %v1784_v54 }
 0x26a   : > { %v1884_v33 = vadd.f32 %v1883_v44, %v1852_v62  ;;  %v1822_v6 = vmul.f32 %v3540_v37, %v1783_v46  ;;  %v1786_v23 = vmul.f32 %v1754_v45, %v1754_v45  ;;  %v1753_v39 = vsub.f32 %v2735_v55, %v3264_v1  ;;  %v1532_v53 = vpop.f32.mrf.mxu1 }
 0x26b   : > { %v2737_v3 = vpop.eup %2736  ;;  %2754 = vpow2.f32 %v2204_v63  ;;  %v2206_v2 = vmul.f32 -1.442695, %v1503_v48  ;;  %v2209_v51 = vmul.f32 -1.442695, %v1518_v10  ;;  %v1513_v16 = vadd.f32 %v3426_v29, %v1512_v0 }
 0x26c   : > { %v2739_v56 = vpop.eup %2738  ;;  %v1854_v58 = vmul.f32 %v3506_v49, %v1822_v6  ;;  %v1885_v25 = vadd.f32 %v1884_v33, %v1853_v52  ;;  %v1756_v40 = vsub.f32 %v2737_v3, %v3283_v13  ;;  %v1785_v30 = vmul.f32 %v1753_v39, %v1753_v39  ;;  %v2480_v63 = vpop.f32.mrf.mxu1 }
 0x26d   : > { %v2741_v7 = vpop.eup %2740  ;;  %v1666_v47 = vadd.f32 1.0, %v2739_v56  ;;  %2756 = vpow2.f32 %v2207_v18  ;;  %v1855_v50 = vmul.f32 %v3496_v4, %v1823_v57  ;;  %v1528_v21 = vadd.f32 %v2474_v36, %v3426_v29 }
 0x26e   : > { %v1886_v42 = vadd.f32 %v1885_v25, %v1854_v58  ;;  %v1755_v1 = vsub.f32 %v2741_v7, %v3276_v8  ;;  %v1825_v49 = vmul.f32 %v3540_v37, %v1786_v23  ;;  %v1824_v13 = vmul.f32 %v3540_v37, %v1785_v30  ;;  %v1542_v23 = vpop.f32.mrf.mxu1 }
 0x26f   : > { %v2743_v11 = vpop.eup %2742  ;;  %v1788_v24 = vmul.f32 %v1756_v40, %v1756_v40  ;;  %2758 = vrcp.f32 %v1666_v47  ;;  %v719_v60 = vadd.s32 144, %v3177_v5  ;;  %v1523_v0 = vadd.f32 %v3426_v29, %v1522_v61 }
 0x270   : > { %v1887_v54 = vadd.f32 %v1886_v42, %v1855_v50  ;;  %v1787_v17 = vmul.f32 %v1755_v1, %v1755_v1  ;;  %v1856_v4 = vmul.f32 %v3522_v12, %v1824_v13  ;;  %2760 = vpow2.f32 %v2206_v2 }
 0x271   : > { %v2745_v62 = vpop.eup %2744  ;;  %v2208_v8 = vmul.f32 -1.442695, %v1513_v16  ;;  %v1538_v36 = vadd.f32 %v2477_v38, %v3426_v29  ;;  %v1758_v46 = vsub.f32 %v2743_v11, %v3295_v19  ;;  %vm783_vm0 = vcmp.lt.s32.totalorder %v3590_v9, 500 }
 0x272   : > { %v2747_v48 = vpop.eup %2746  ;;  %v1826_v44 = vmul.f32 %v3540_v37, %v1787_v17  ;;  %v1757_v45 = vsub.f32 %v2745_v62, %v3288_v15  ;;  %v2211_v10 = vmul.f32 -1.442695, %v1528_v21  ;;  %v1857_v61 = vmul.f32 %v3518_v35, %v1825_v49 }
 0x273   : > { %v2749_v55 = vpop.eup %2748  ;;  %v1888_v18 = vadd.f32 %v1887_v54, %v1856_v4  ;;  %v1827_v12 = vmul.f32 %v3540_v37, %v1788_v24  ;;  %2762 = vpow2.f32 %v2209_v51  ;;  %v2210_v6 = vmul.f32 -1.442695, %v1523_v0 }
 0x274   : > { %v2751_v52 = vpop.eup %2750  ;;  %v1858_v38 = vmul.f32 %v3534_v31, %v1826_v44  ;;  %v1789_v33 = vmul.f32 %v1757_v45, %v1757_v45  ;;  %v1665_v57 = vadd.f32 1.0, %v2749_v55  ;;  %2764 = vpow2.f32 %v2208_v8 }
 0x275   : > { %v1889_v3 = vadd.f32 %v1888_v18, %v1857_v61  ;;  %v1759_v19 = vsub.f32 %v2751_v52, %v3300_v22  ;;  %v2213_v15 = vmul.f32 -1.442695, %v1538_v36  ;;  %v1790_v2 = vmul.f32 %v1758_v46, %v1758_v46 }
 0x276   : > { %v2753_v39 = vpop.eup %2752  ;;  %v1828_v35 = vmul.f32 %v3540_v37, %v1789_v33  ;;  %2766 = vrcp.f32 %v1665_v57  ;;  %v1533_v56 = vadd.f32 %v3426_v29, %v1532_v53  ;;  %v1859_v58 = vmul.f32 %v3527_v32, %v1827_v12 }
 0x277   : > { %v1890_v25 = vadd.f32 %v1889_v3, %v1858_v38  ;;  %v1668_v31 = vadd.f32 1.0, %v2753_v39  ;;  %v1548_v40 = vadd.f32 %v2480_v63, %v3426_v29  ;;  %v1791_v22 = vmul.f32 %v1759_v19, %v1759_v19 }
 0x278   : > { %v2755_v51 = vpop.eup %2754  ;;  %v1860_v7 = vmul.f32 %v3565_v43, %v1828_v35  ;;  %2768 = vpow2.f32 %v2211_v10  ;;  %v1543_v30 = vadd.f32 %v3426_v29, %v1542_v23  ;;  %v1760_v16 = vsub.f32 %v2747_v48, %v3307_v26 }
 0x279   : > { %v1891_v47 = vadd.f32 %v1890_v25, %v1859_v58  ;;  %v754_v50 = vadd.s32 %v3431_v27, %v3593_v59  ;;  %2770 = vrcp.f32 %v1668_v31  ;;  %v1829_v32 = vmul.f32 %v3540_v37, %v1790_v2  ;;  %v3879_v2 = vld [vmem:[#allocation13_spill] sm:$0xff] }
 0x27a   : > { %v2757_v53 = vpop.eup %2756  ;;  %v1667_v42 = vadd.f32 1.0, %v2755_v51  ;;  %2772 = vpow2.f32 %v2210_v6  ;;  %v2212_v1 = vmul.f32 -1.442695, %v1533_v56  ;;  %v753_v21 = vadd.s32 %v3431_v27, %v719_v60 }
 0x27b   : > { %v1670_v43 = vadd.f32 1.0, %v2757_v53  ;;  %2774 = vpow2.f32 %v2213_v15  ;;  %v2215_v11 = vmul.f32 -1.442695, %v1548_v40  ;;  %v1892_v29 = vadd.f32 %v1891_v47, %v1860_v7  ;;  %v3880_v53 = vld [vmem:[#allocation12_spill] sm:$0xff] }
 0x27c   : > { %v2759_v49 = vpop.eup %2758  ;;  %v1830_v13 = vmul.f32 %v3540_v37, %v1791_v22  ;;  %2776 = vrcp.f32 %v1667_v42  ;;  %v2214_v26 = vmul.f32 -1.442695, %v1543_v30  ;;  %v2134_v59 = vsel %vm783_vm0, 1.0, %v3878_v41 }
 0x27d   : > { %v722_v24 = vadd.s32 168, %v3177_v5  ;;  %v721_v54 = vadd.s32 160, %v3177_v5  ;;  %2778 = vrcp.f32 %v1670_v43  ;;  %v2761_v17 = vpop.eup %2760  ;;  %v1861_v60 = vmul.f32 %v3545_v20, %v1829_v32 }
 0x27e   : > { %vm784_vm1 = vcmp.lt.s32.totalorder %v3551_v14, 500  ;;  %v1792_v0 = vmul.f32 %v1760_v16, %v1760_v16  ;;  %2780 = vpow2.f32 %v2212_v1  ;;  %vm786_vm2 = vcmp.lt.s32.totalorder %v754_v50, 500  ;;  %v3881_v1 = vld [vmem:[#allocation15_spill] sm:$0xff] }
 0x27f   : > { %v1762_v62 = vsub.f32 %v2759_v49, %v3319_v34  ;;  %v1669_v4 = vadd.f32 1.0, %v2761_v17  ;;  %2782 = vpow2.f32 %v2215_v11  ;;  %v1862_v9 = vmul.f32 %v2134_v59, %v1830_v13 }
 0x280   : > { %v2763_v8 = vpop.eup %2762  ;;  %v1893_v36 = vadd.f32 %v1892_v29, %v1861_v60  ;;  %vm785_vm3 = vcmp.lt.s32.totalorder %v753_v21, 500  ;;  %2784 = vpow2.f32 %v2214_v26  ;;  %v3640_v63 = vadd.s32 %v3431_v27, %v722_v24 }
 0x281   : > { %v755_v48 = vadd.s32 %v3431_v27, %v721_v54  ;;  %2786 = vrcp.f32 %v1669_v4  ;;  %v1672_v20 = vadd.f32 1.0, %v2763_v8  ;;  %v2765_v44 = vpop.eup %2764  ;;  %v1831_v46 = vmul.f32 %v3540_v37, %v1792_v0 }
 0x282   : > { %v723_v45 = vadd.s32 176, %v3177_v5  ;;  %v2135_v10 = vsel %vm784_vm1, 1.0, %v3878_v41  ;;  %v1794_v55 = vmul.f32 %v1762_v62, %v1762_v62  ;;  %v1671_v61 = vadd.f32 1.0, %v2765_v44 }
 0x283   : > { %v2767_v34 = vpop.eup %2766  ;;  %2788 = vrcp.f32 %v1672_v20  ;;  %v1894_v18 = vadd.f32 %v1893_v36, %v1862_v9  ;;  %v2137_v12 = vsel %vm786_vm2, 1.0, %v3878_v41  ;;  %v2136_v52 = vsel %vm785_vm3, 1.0, %v3878_v41  ;;  %v3882_v20 = vld [vmem:[#allocation14_spill] sm:$0xff] }
 0x284   : > { %v1761_v38 = vsub.f32 %v2767_v34, %v3312_v28  ;;  %vm788_vm4 = vcmp.lt.s32.totalorder %v3640_v63, 500  ;;  %vm787_vm5 = vcmp.lt.s32.totalorder %v755_v48, 500  ;;  %v724_v57 = vadd.s32 184, %v3177_v5 }
 0x285   : > { %v2769_v33 = vpop.eup %2768  ;;  %2790 = vrcp.f32 %v1671_v61  ;;  %v1863_v6 = vmul.f32 %v2135_v10, %v1831_v46  ;;  %v757_v19 = vadd.s32 %v3431_v27, %v723_v45  ;;  %v1833_v39 = vmul.f32 %v3540_v37, %v1794_v55  ;;  %v3883_v55 = vld [vmem:[#allocation17_spill] sm:$0xff] }
 0x286   : > { %v2771_v14 = vpop.eup %2770  ;;  %v1793_v3 = vmul.f32 %v1761_v38, %v1761_v38  ;;  %v1674_v15 = vadd.f32 1.0, %v2769_v33  ;;  %v726_v28 = vadd.s32 200, %v3177_v5  ;;  %v725_v56 = vadd.s32 192, %v3177_v5 }
 0x287   : > { %v2773_v23 = vpop.eup %2772  ;;  %v1764_v35 = vsub.f32 %v2771_v14, %v3879_v2  ;;  %v1895_v31 = vadd.f32 %v1894_v18, %v1863_v6  ;;  %v2138_v22 = vsel %vm787_vm5, 1.0, %v3878_v41  ;;  %v758_v30 = vadd.s32 %v3431_v27, %v724_v57  ;;  %v3884_v6 = vld [vmem:[#allocation16_spill] sm:$0xff] }
 0x288   : > { %v2775_v58 = vpop.eup %2774  ;;  %v1832_v25 = vmul.f32 %v3540_v37, %v1793_v3  ;;  %2792 = vrcp.f32 %v1674_v15  ;;  %v1673_v40 = vadd.f32 1.0, %v2773_v23  ;;  %vm789_vm6 = vcmp.lt.s32.totalorder %v757_v19, 500 }
 0x289   : > { %v2777_v51 = vpop.eup %2776  ;;  %v1796_v7 = vmul.f32 %v1764_v35, %v1764_v35  ;;  %v1676_v47 = vadd.f32 1.0, %v2775_v58  ;;  %v760_v43 = vadd.s32 %v3431_v27, %v726_v28  ;;  %v759_v11 = vadd.s32 %v3431_v27, %v725_v56 }
 0x28a   : > { %v2779_v16 = vpop.eup %2778  ;;  %v1864_v50 = vmul.f32 %v2136_v52, %v1832_v25  ;;  %v1763_v32 = vsub.f32 %v2777_v51, %v3880_v53  ;;  %2794 = vrcp.f32 %v1673_v40  ;;  %v1865_v29 = vmul.f32 %v2137_v12, %v1833_v39  ;;  %v3885_v25 = vld [vmem:[#allocation19_spill] sm:$0xff]  ;;  %v3886_v53 = vld [vmem:[#allocation18_spill] sm:$0xff] }
 0x28b   : > { %v2781_v42 = vpop.eup %2780  ;;  %v1766_v21 = vsub.f32 %v2779_v16, %v3881_v1  ;;  %2796 = vrcp.f32 %v1676_v47  ;;  %v1835_v54 = vmul.f32 %v3540_v37, %v1796_v7  ;;  %v728_v17 = vadd.s32 216, %v3177_v5 }
 0x28c   : > { %v2783_v49 = vpop.eup %2782  ;;  %v1896_v13 = vadd.f32 %v1895_v31, %v1864_v50  ;;  %v1795_v26 = vmul.f32 %v1763_v32, %v1763_v32  ;;  %v1675_v59 = vadd.f32 1.0, %v2781_v42  ;;  %v727_v60 = vadd.s32 208, %v3177_v5 }
 0x28d   : > { %v2785_v24 = vpop.eup %2784  ;;  %v1678_v0 = vadd.f32 1.0, %v2783_v49  ;;  %v2139_v36 = vsel %vm788_vm4, 1.0, %v3878_v41  ;;  %v1798_v48 = vmul.f32 %v1766_v21, %v1766_v21  ;;  %vm790_vm7 = vcmp.lt.s32.totalorder %v758_v30, 500 }
 0x28e   : > { %v2787_v62 = vpop.eup %2786  ;;  %v1834_v4 = vmul.f32 %v3540_v37, %v1795_v26  ;;  %v1897_v8 = vadd.f32 %v1896_v13, %v1865_v29  ;;  %2798 = vrcp.f32 %v1675_v59  ;;  %v1677_v9 = vadd.f32 1.0, %v2785_v24 }
 0x28f   : > { %v1765_v44 = vsub.f32 %v2787_v62, %v3882_v20  ;;  %2800 = vrcp.f32 %v1678_v0  ;;  %v2140_v34 = vsel %vm789_vm6, 1.0, %v3878_v41  ;;  %vm792_vm8 = vcmp.lt.s32.totalorder %v760_v43, 500 }
 0x290   : > { %v2789_v46 = vpop.eup %2788  ;;  %v1866_v45 = vmul.f32 %v2138_v22, %v1834_v4  ;;  %2802 = vrcp.f32 %v1677_v9  ;;  %vm791_vm9 = vcmp.lt.s32.totalorder %v759_v11, 500  ;;  %v1867_v12 = vmul.f32 %v2139_v36, %v1835_v54  ;;  %v3887_v11 = vld [vmem:[#allocation21_spill] sm:$0xff] }
 0x291   : > { %v1797_v10 = vmul.f32 %v1765_v44, %v1765_v44  ;;  %v1768_v61 = vsub.f32 %v2789_v46, %v3883_v55  ;;  %v762_v52 = vadd.s32 %v3431_v27, %v728_v17  ;;  %v761_v38 = vadd.s32 %v3431_v27, %v727_v60  ;;  %v3889_v44 = vld [vmem:[#allocation11_spill] sm:$0xff] }
 0x292   : > { %v2791_v18 = vpop.eup %2790  ;;  %v1898_v63 = vadd.f32 %v1897_v8, %v1866_v45  ;;  %v1837_v33 = vmul.f32 %v3540_v37, %v1798_v48  ;;  %v2141_v19 = vsel %vm790_vm7, 1.0, %v3878_v41  ;;  %v730_v23 = vadd.s32 232, %v3177_v5 }
 0x293   : > { %v1836_v57 = vmul.f32 %v3540_v37, %v1797_v10  ;;  %v1800_v14 = vmul.f32 %v1768_v61, %v1768_v61  ;;  %v1767_v3 = vsub.f32 %v2791_v18, %v3884_v6  ;;  %v729_v39 = vadd.s32 224, %v3177_v5  ;;  %v3890_v10 = vld [vmem:[#allocation22_spill] sm:$0xff] }
 0x294   : > { %v1899_v15 = vadd.f32 %v1898_v63, %v1867_v12  ;;  %v2143_v28 = vsel %vm792_vm8, 1.0, %v3878_v41  ;;  %v2142_v56 = vsel %vm791_vm9, 1.0, %v3878_v41  ;;  %vm794_vm10 = vcmp.lt.s32.totalorder %v762_v52, 500 }
 0x295   : > { %v2793_v2 = vpop.eup %2792  ;;  %v1868_v35 = vmul.f32 %v2140_v34, %v1836_v57  ;;  %v1799_v58 = vmul.f32 %v1767_v3, %v1767_v3  ;;  %vm793_vm11 = vcmp.lt.s32.totalorder %v761_v38, 500  ;;  %v731_v40 = vadd.s32 240, %v3177_v5 }
 0x296   : > { %v1770_v31 = vsub.f32 %v2793_v2, %v3885_v25  ;;  %v1869_v7 = vmul.f32 %v2141_v19, %v1837_v33  ;;  %v1839_v30 = vmul.f32 %v3540_v37, %v1800_v14  ;;  %v764_v42 = vadd.s32 %v3431_v27, %v730_v23 }
 0x297   : > { %v2795_v51 = vpop.eup %2794  ;;  %v1900_v22 = vadd.f32 %v1899_v15, %v1868_v35  ;;  %v1838_v47 = vmul.f32 %v3540_v37, %v1799_v58  ;;  %v763_v1 = vadd.s32 %v3431_v27, %v729_v39  ;;  %v732_v29 = vadd.s32 248, %v3177_v5  ;;  %v3888_v5 = vld [vmem:[#allocation20_spill] sm:$0xff] }
 0x298   : > { %v2797_v16 = vpop.eup %2796  ;;  %v1802_v50 = vmul.f32 %v1770_v31, %v1770_v31  ;;  %v1769_v32 = vsub.f32 %v2795_v51, %v3886_v53  ;;  %v2144_v13 = vsel %vm793_vm11, 1.0, %v3878_v41  ;;  %v765_v59 = vadd.s32 %v3431_v27, %v731_v40 }
 0x299   : > { %v1870_v21 = vmul.f32 %v2142_v56, %v1838_v47  ;;  %v1901_v43 = vadd.f32 %v1900_v22, %v1869_v7  ;;  %v1772_v49 = vsub.f32 %v2797_v16, %v3887_v11  ;;  %v1871_v54 = vmul.f32 %v2143_v28, %v1839_v30  ;;  %v1878_v22 = vld [vmem:[#allocation2] sm:$0x1] }
 0x29a   : > { %v1801_v26 = vmul.f32 %v1769_v32, %v1769_v32  ;;  %v1841_v60 = vmul.f32 %v3540_v37, %v1802_v50  ;;  %v2145_v4 = vsel %vm794_vm10, 1.0, %v3878_v41  ;;  %vm795_vm12 = vcmp.lt.s32.totalorder %v763_v1, 500 }
 0x29b   : > { %v2799_v24 = vpop.eup %2798  ;;  %v1902_v17 = vadd.f32 %v1901_v43, %v1870_v21  ;;  %v1804_v0 = vmul.f32 %v1772_v49, %v1772_v49  ;;  %vm796_vm13 = vcmp.lt.s32.totalorder %v764_v42, 500  ;;  %v766_v20 = vadd.s32 %v3431_v27, %v732_v29 }
 0x29c   : > { %v2801_v62 = vpop.eup %2800  ;;  %v1840_v8 = vmul.f32 %v3540_v37, %v1801_v26  ;;  %v1771_v9 = vsub.f32 %v2799_v24, %v3888_v5  ;;  %vm797_vm14 = vcmp.lt.s32.totalorder %v765_v59, 500  ;;  %v1873_v61 = vmul.f32 %v2145_v4, %v1841_v60 }
 0x29d   : > { %v2803_v36 = vpop.eup %2802  ;;  %v1903_v48 = vadd.f32 %v1902_v17, %v1871_v54  ;;  %v1774_v46 = vsub.f32 %v2801_v62, %v3889_v44  ;;  %v1843_v18 = vmul.f32 %v3540_v37, %v1804_v0  ;;  %v2146_v12 = vsel %vm795_vm12, 1.0, %v3878_v41 }
 0x29e   : > { %v1872_v45 = vmul.f32 %v2144_v13, %v1840_v8  ;;  %v1803_v34 = vmul.f32 %v1771_v9, %v1771_v9  ;;  %v1773_v55 = vsub.f32 %v2803_v36, %v3890_v10  ;;  %v2147_v57 = vsel %vm796_vm13, 1.0, %v3878_v41 }
 0x29f   : > { %v1806_v38 = vmul.f32 %v1774_v46, %v1774_v46  ;;  %v2148_v27 = vsel %vm797_vm14, 1.0, %v3878_v41  ;;  %vm798_vm15 = vcmp.lt.s32.totalorder %v766_v20, 500  ;;  %v1875_v19 = vmul.f32 %v2147_v57, %v1843_v18 }
 0x2a0   : > { %v1904_v63 = vadd.f32 %v1903_v48, %v1872_v45  ;;  %v1842_v52 = vmul.f32 %v3540_v37, %v1803_v34  ;;  %v1805_v33 = vmul.f32 %v1773_v55, %v1773_v55  ;;  %v2149_v2 = vsel %vm798_vm15, 1.0, %v3878_v41 }
 0x2a1   : > { %v1845_v23 = vmul.f32 %v3540_v37, %v1806_v38 }
 0x2a2   : > { %v1874_v14 = vmul.f32 %v2146_v12, %v1842_v52  ;;  %v1905_v6 = vadd.f32 %v1904_v63, %v1873_v61  ;;  %v1844_v3 = vmul.f32 %v3540_v37, %v1805_v33 }
 0x2a3   : > { %v1877_v28 = vmul.f32 %v2149_v2, %v1845_v23 }
 0x2a4   : > { %v1906_v15 = vadd.f32 %v1905_v6, %v1874_v14  ;;  %v1876_v39 = vmul.f32 %v2148_v27, %v1844_v3 }
 0x2a6   : > { %v1907_v35 = vadd.f32 %v1906_v15, %v1875_v19 }
 0x2a8   : > { %v1908_v56 = vadd.f32 %v1907_v35, %v1876_v39 }
 0x2aa   : > { %v1909_v58 = vadd.f32 %v1908_v56, %v1877_v28 }
 0x2ac   : > { %v1910_v25 = vrot.slane %v1909_v58, 4 }
 0x2ae   : > { %v1911_v31 = vadd.f32 %v1910_v25, %v1909_v58 }
 0x2b0   : > { %v1912_v40 = vrot.slane %v1911_v31, 2 }
 0x2b2   : > { %v1913_v51 = vadd.f32 %v1912_v40, %v1911_v31 }
 0x2b4   : > { %v1914_v7 = vrot.slane %v1913_v51, 1 }
 0x2b6   : > { %v1915_v30 = vadd.f32 %v1914_v7, %v1913_v51  ;;  %1921 = sbr.rel (%p2217_p13) target bundleno = 1230 (0x4ce), region = 104 }
 0x2b8   : > { %v1916_v47 = vadd.f32 %v1915_v30, %v1878_v22 }
 0x2ba   : > { %1917 = vst [vmem:[#allocation2] sm:$0x1] %v1916_v47 }
 0x2bb   : > { %v1922_v41 = vld [vmem:[%s3808_s8] sm:$0xff]  ;;  %v1923_v16 = vld [vmem:[%s3808_s8 + $0x8] sm:$0xff]  ;;  %v2953_v32 = vmov 0   ;;  %vm2035_vm5 = vcmask 7168   ;;  %vm1987_vm7 = vcmask 130048  }
 0x2bc   : > { %2804 = vset.pattern.permute.xlu1 %v2953_v32  ;;  %2805 = vset.pattern.permute.xlu0 %v2953_v32  ;;  %v1937_v42 = vld [vmem:[%s3809_s9] sm:$0xff]  ;;  %v1938_v29 = vld [vmem:[%s3809_s9 + $0x8] sm:$0xff] }
 0x2bd   : > { %v1959_v1 = vld [vmem:[%s3810_s10] sm:$0xff]  ;;  %v1960_v13 = vld [vmem:[%s3810_s10 + $0x8] sm:$0xff] }
 0x2be   : > { %v1963_v21 = vld [vmem:[%s3811_s11] sm:$0xff]  ;;  %v1964_v26 = vld [vmem:[%s3811_s11 + $0x8] sm:$0xff] }
 0x2bf   : > { %v1965_v49 = vsub.f32 %v1963_v21, %v1959_v1  ;;  %v1966_v17 = vsub.f32 %v1964_v26, %v1960_v13  ;;  %v1973_v63 = vld [vmem:[%s3812_s12] sm:$0xff]  ;;  %v1974_v38 = vld [vmem:[%s3812_s12 + $0x8] sm:$0xff] }
 0x2c0   : > { %v1997_v35 = vld [vmem:[%s3891_s20] sm:$0x1]  ;;  %v2006_v51 = vld [vmem:[%s3892_s27 + $0x8] sm:$0xff] }
 0x2c1   : > { %v2218_v37 = vld [vmem:[#allocation2] ss:$0 sm:$0xff]  ;;  %v1967_v54 = vadd.f32 1e-16, %v1965_v49  ;;  %v1968_v60 = vadd.f32 1e-16, %v1966_v17 }
 0x2c2   : > { %v1931_v50 = vmul.f32 %v2218_v37, %v1922_v41  ;;  %v1932_v53 = vmul.f32 %v2218_v37, %v1923_v16  ;;  %v2005_v7 = vld [vmem:[%s3893_s15] sm:$0xff] }
 0x2c3   : > { %v3894_v22 = vld [vmem:[#allocation10_spill] sm:$0xff] }
 0x2c4   : > { %1933 = vadd.xlane.f32.xlu0 %v1931_v50  ;;  %v2020_v50 = vld [vmem:[%s3895_s13 + $0x8] sm:$0xff] }
 0x2c8   : > { %1935 = vadd.xlane.f32.xlu0 %v1932_v53  ;;  %v2019_v53 = vld [vmem:[%s3895_s13] sm:$0xff] }
 0x34d   : > { %v1934_v43 = vpop.xlane.xlu0 %1933 }
 0x34e   : > { %v1939_v11 = vmul.f32 %v1937_v42, %v1934_v43 }
 0x350   : > { %2806 = vrsqrt.f32 %v1939_v11  ;;  %vm1943_vm0 = vcmp.eq.f32.partialorder %v1939_v11, inf  ;;  %v1946_v4 = vand.u32 2147483648, %v1939_v11  ;;  %vm1945_vm1 = vcmp.eq.f32.partialorder %v1939_v11, 0.0 }
 0x351   : > { %v1936_v59 = vpop.xlane.xlu0 %1935 }
 0x352   : > { %v1940_v24 = vmul.f32 %v1938_v29, %v1936_v59 }
 0x354   : > { %2808 = vrsqrt.f32 %v1940_v24  ;;  %vm1950_vm3 = vcmp.eq.f32.partialorder %v1940_v24, inf  ;;  %v1953_v44 = vand.u32 2147483648, %v1940_v24  ;;  %vm1952_vm4 = vcmp.eq.f32.partialorder %v1940_v24, 0.0 }
 0x355   : > { %2810 = vrcp.f32 %v1967_v54 }
 0x356   : > { %2812 = vrcp.f32 %v1968_v60 }
 0x35d   : > { %v2807_v0 = vpop.eup %2806 }
 0x35e   : > { %v1942_v62 = vmul.f32 %v2807_v0, %v1939_v11 }
 0x360   : > { %v1944_v8 = vsel %vm1943_vm0, %v1939_v11, %v1942_v62 }
 0x361   : > { %v2809_v5 = vpop.eup %2808  ;;  %v1947_v9 = vsel %vm1945_vm1, %v1946_v4, %v1944_v8 }
 0x362   : > { %vm1955_vm2 = vcmp.eq.f32.partialorder %v1947_v9, 0.0  ;;  %v1949_v36 = vmul.f32 %v2809_v5, %v1940_v24  ;;  %v2811_v48 = vpop.eup %2810 }
 0x363   : > { %v1957_v20 = vsel %vm1955_vm2, 0.01, %v1947_v9  ;;  %v2813_v55 = vpop.eup %2812 }
 0x364   : > { %v1961_v46 = vsub.f32 %v1957_v20, %v1959_v1  ;;  %v1951_v45 = vsel %vm1950_vm3, %v1940_v24, %v1949_v36 }
 0x365   : > { %v1954_v34 = vsel %vm1952_vm4, %v1953_v44, %v1951_v45 }
 0x366   : > { %v1970_v10 = vmul.f32 %v2811_v48, %v1961_v46  ;;  %vm1956_vm6 = vcmp.eq.f32.partialorder %v1954_v34, 0.0 }
 0x367   : > { %v1958_v61 = vsel %vm1956_vm6, 0.01, %v1954_v34 }
 0x368   : > { %1977 = vperm.xlu1 %2804, %v1970_v10   ;;  %2038 = vst.msk [vmem:[%s3817_s17] sm:$0xff] %vm2035_vm5, %v1970_v10  ;;  %v1962_v18 = vsub.f32 %v1958_v61, %v1960_v13 }
 0x36a   : > { %v1972_v12 = vmul.f32 %v2813_v55, %v1962_v18 }
 0x36c   : > { %1982 = vperm.xlu1 %2804, %v1972_v12   ;;  %2039 = vst.msk [vmem:[%s3817_s17 + $0x8] sm:$0xff] %vm2035_vm5, %v1972_v12 }
 0x3e3   : > { %v1978_v52 = vpop.permute.xlu1 %1977 }
 0x3e4   : > { %v1985_v33 = vmul.f32 %v1978_v52, %v1973_v63 }
 0x3e6   : > { %v1988_v14 = vsel %vm1987_vm7, %v1985_v33, 0.0 }
 0x3e7   : > { %v1983_v57 = vpop.permute.xlu1 %1982 }
 0x3e8   : > { %v1986_v27 = vmul.f32 %v1983_v57, %v1974_v38 }
 0x3ea   : > { %v1989_v6 = vsel %vm1987_vm7, %v1986_v27, 0.0 }
 0x3eb   : > { %v1990_v3 = vadd.f32 %v1989_v6, %v1988_v14 }
 0x3ed   : > { %v1991_v19 = vrot.slane %v1990_v3, 4 }
 0x3ef   : > { %v1992_v15 = vadd.f32 %v1991_v19, %v1990_v3 }
 0x3f1   : > { %v1993_v23 = vrot.slane %v1992_v15, 2 }
 0x3f3   : > { %v1994_v39 = vadd.f32 %v1993_v23, %v1992_v15 }
 0x3f5   : > { %v1995_v2 = vrot.slane %v1994_v39, 1 }
 0x3f7   : > { %v1996_v28 = vadd.f32 %v1995_v2, %v1994_v39 }
 0x3f9   : > { %v1998_v56 = vadd.f32 %v1997_v35, %v1996_v28 }
 0x3fb   : > { %v2219_v58 = vmul.f32 -1.442695, %v1998_v56 }
 0x3fd   : > { %2814 = vpow2.f32 %v2219_v58 }
 0x40a   : > { %v2815_v25 = vpop.eup %2814 }
 0x40b   : > { %v2002_v31 = vadd.f32 1.0, %v2815_v25 }
 0x40d   : > { %2816 = vrcp.f32 %v2002_v31 }
 0x41a   : > { %v2817_v40 = vpop.eup %2816 }
 0x41b   : > { %v2010_v30 = vrot.slane %v2817_v40, %v3894_v22 }
 0x41d   : > { %v2012_v47 = vmul.f32 %v2010_v30, %v2006_v51  ;;  %v2011_v41 = vmul.f32 %v2010_v30, %v2005_v7 }
 0x41f   : > { %v2016_v37 = vsel %vm1987_vm7, %v2012_v47, 0.0  ;;  %v2013_v16 = vsel %vm1987_vm7, %v2011_v41, 0.0 }
 0x420   : > { %2017 = vadd.xlane.f32.xlu1 %v2016_v37  ;;  %2014 = vadd.xlane.f32.xlu0 %v2013_v16 }
 0x4a9   : > { %v2018_v32 = vpop.xlane.xlu1 %2017  ;;  %v2015_v42 = vpop.xlane.xlu0 %2014 }
 0x4aa   : > { %v2022_v1 = vadd.f32 %v2020_v50, %v2018_v32  ;;  %v2021_v21 = vadd.f32 %v2019_v53, %v2015_v42 }
 0x4ac   : > { %v2221_v43 = vmul.f32 -1.442695, %v2022_v1  ;;  %v2220_v11 = vmul.f32 -1.442695, %v2021_v21 }
 0x4ae   : > { %2818 = vpow2.f32 %v2221_v43 }
 0x4af   : > { %2820 = vpow2.f32 %v2220_v11 }
 0x4bb   : > { %v2819_v49 = vpop.eup %2818 }
 0x4bc   : > { %v2821_v29 = vpop.eup %2820  ;;  %v2030_v13 = vadd.f32 1.0, %v2819_v49 }
 0x4bd   : > { %v2029_v26 = vadd.f32 1.0, %v2821_v29 }
 0x4be   : > { %2822 = vrcp.f32 %v2030_v13 }
 0x4bf   : > { %2824 = vrcp.f32 %v2029_v26 }
 0x4cb   : > { %v2823_v59 = vpop.eup %2822 }
 0x4cc   : > { %v2825_v24 = vpop.eup %2824  ;;  %2037 = vst.msk [vmem:[%s3896_s24 + $0x8] sm:$0xff] %vm2035_vm5, %v2823_v59 }
 0x4cd   : > { %2036 = vst.msk [vmem:[%s3897_s19] sm:$0xff] %vm2035_vm5, %v2825_v24 }
 0x4ce PF: > { %p29_p2 = scmp.ge.s32.totalorder %s3113_s18, 4   ;;  %s3898_s24 = smov %s2936_s25 }
 0x4cf   : > { %s3899_s25 = smov %s2940_s26  ;;  %s3900_s26 = smov %s3124_s30 }
 0x4d0   : > { %s3901_s27 = smov %s3113_s18  ;;  %31 = sbr.rel (!%p29_p2) target bundleno = 13 (0xd), region = 144 }
 0x4d5   :  { %2057 = vsyncpa [#allocation4], 1 }
 0x4d6   :  { %2059 = vsyncpa [#allocation4 + $0x1], 1 }
 0x4d7   :  { %2060 = vsyncpa [#allocation6], 1 }

</bundles_post_ra>
